<compile_context>
chip_gen: v7x
topology: tpu7x:2x2x1
jax: 0.10.0
libtpu: 0.0.40
codegen_flags: <defaults>
</compile_context>

<pallas_src>
import jax
import jax.numpy as jnp
from jax.experimental import pallas as pl
from jax.experimental.pallas import tpu as pltpu

LEAKY_SLOPE = 0.01  # nn.LeakyReLU() default negative_slope


def _leaky_relu(x):
    return jnp.where(x > 0, x, LEAKY_SLOPE * x)


def _round_up(x, m):
    return ((x + m - 1) // m) * m


def graph_layer_kernel(adj_ref,                       # (tm, tk)  adj tile
                       cxk_ref, nxk_ref,              # (tk, 1)   code cols @ k
                       cek_ref, nek_ref,              # (tk, C)   embeddings @ k
                       cxi_ref, nxi_ref,              # (tm, 1)   code cols @ i
                       cei_ref, nei_ref,              # (tm, C)   embeddings @ i
                       wt_ref, b_ref,                 # (C, Gp), (1, Gp)
                       out_ref,                       # (2, tm, Gp) packed co/no
                       acc_ref):                      # (tm, C) f32 scratch
    k = pl.program_id(1)

    @pl.when(k == 0)
    def _init():
        acc_ref[...] = jnp.zeros_like(acc_ref)

    # Masked embedding sum for this column tile: (ce + ne)[k-block].
    emb_sum_k = cxk_ref[...] * cek_ref[...] + nxk_ref[...] * nek_ref[...]
    adj_tile = adj_ref[...].astype(jnp.float32)
    # s += adj[i-block, k-block] @ (ce + ne)[k-block]  -- single fused propagation matmul
    acc_ref[...] += jnp.dot(adj_tile, emb_sum_k,
                            preferred_element_type=jnp.float32)

    @pl.when(k == pl.num_programs(1) - 1)
    def _finalize():
        s = acc_ref[...]                     # adj @ (ce + ne) for this row tile
        cx = cxi_ref[...]
        nx = nxi_ref[...]
        ce = cx * cei_ref[...]
        ne = nx * nei_ref[...]
        co_in = ce + cx * s                  # center_emb + cc + cn
        no_in = ne + nx * s                  # neighbor_emb + nn + nc
        tm = co_in.shape[0]
        # Fused dense: one (2*tm, C) @ (C, Gp) matmul for both outputs.
        x2 = jnp.concatenate([co_in, no_in], axis=0)
        y2 = jnp.dot(x2, wt_ref[...], preferred_element_type=jnp.float32)
        y2 = _leaky_relu(y2 + b_ref[...])
        out_ref[0] = y2[:tm]
        out_ref[1] = y2[tm:]


def graph_layer(code_x, neighbor, c_embeddings, n_embeddings, adj, w, b,
                *, adj_bf16=False, tm_max=256, tk_max=512):
    """Pallas GraphLayer forward.

    code_x, neighbor : (N,)   float32 (0/1 masks in the model)
    c/n_embeddings   : (N, C) float32
    adj              : (N, N) float32
    w                : (G, C) float32  (PyTorch nn.Linear weight layout)
    b                : (G,)   float32
    returns (co, no) : each (N, G) float32

    adj_bf16=True halves adj HBM traffic; exact when adj is a 0/1 adjacency.
    """
    n, c = c_embeddings.shape
    g = w.shape[0]
    f32 = jnp.float32

    # ---- pad to TPU-friendly shapes ------------------------------------
    np_ = _round_up(n, 128)                 # adj rows/cols, multiple of 128
    gp = _round_up(g, 128)                  # lane-dense output width

    tm = min(_round_up(tm_max, 128), np_)
    tk = min(_round_up(tk_max, 128), np_)
    while np_ % tm:
        tm -= 128
    while np_ % tk:
        tk -= 128

    pad_n = np_ - n
    adj_dtype = jnp.bfloat16 if adj_bf16 else f32
    adj_p = jnp.pad(adj.astype(adj_dtype), ((0, pad_n), (0, pad_n)))
    cx_p = jnp.pad(code_x.astype(f32).reshape(n, 1), ((0, pad_n), (0, 0)))
    nx_p = jnp.pad(neighbor.astype(f32).reshape(n, 1), ((0, pad_n), (0, 0)))
    cemb_p = jnp.pad(c_embeddings.astype(f32), ((0, pad_n), (0, 0)))
    nemb_p = jnp.pad(n_embeddings.astype(f32), ((0, pad_n), (0, 0)))
    wt_p = jnp.pad(jnp.transpose(w).astype(f32), ((0, 0), (0, gp - g)))   # (C, Gp)
    b_p = jnp.pad(b.astype(f32).reshape(1, g), ((0, 0), (0, gp - g)))     # (1, Gp)

    grid = (np_ // tm, np_ // tk)

    in_specs = [
        pl.BlockSpec((tm, tk), lambda i, k: (i, k)),    # adj tile
        pl.BlockSpec((tk, 1), lambda i, k: (k, 0)),     # code_x   @ k
        pl.BlockSpec((tk, 1), lambda i, k: (k, 0)),     # neighbor @ k
        pl.BlockSpec((tk, c), lambda i, k: (k, 0)),     # c_emb    @ k
        pl.BlockSpec((tk, c), lambda i, k: (k, 0)),     # n_emb    @ k
        pl.BlockSpec((tm, 1), lambda i, k: (i, 0)),     # code_x   @ i
        pl.BlockSpec((tm, 1), lambda i, k: (i, 0)),     # neighbor @ i
        pl.BlockSpec((tm, c), lambda i, k: (i, 0)),     # c_emb    @ i
        pl.BlockSpec((tm, c), lambda i, k: (i, 0)),     # n_emb    @ i
        pl.BlockSpec((c, gp), lambda i, k: (0, 0)),     # W^T (padded)
        pl.BlockSpec((1, gp), lambda i, k: (0, 0)),     # bias (padded)
    ]
    out_specs = pl.BlockSpec((2, tm, gp), lambda i, k: (0, i, 0))

    # Advisory cost estimate for XLA's scheduler.
    flops = 2 * np_ * np_ * c + 2 * (2 * np_) * c * gp
    bytes_accessed = (
        adj_p.size * adj_p.dtype.itemsize
        + 2 * (np_ * c + np_) * 4
        + (c * gp + gp) * 4
        + 2 * np_ * gp * 4
    )

    # Double-buffered per-step VMEM footprint, with headroom.
    adj_isz = 2 if adj_bf16 else 4
    tile_bytes = (
        2 * tm * tk * adj_isz                       # adj tile, double-buffered
        + 2 * 2 * (tk * c + tk + tm * c + tm) * 4   # emb/code tiles (k and i views)
        + 2 * (c * gp + gp) * 4                     # weights + bias
        + 2 * 2 * tm * gp * 4                       # packed output block
        + tm * c * 4                                # accumulator scratch
    )
    vmem_limit = min(max(2 * tile_bytes, 16 << 20), 48 << 20)

    out = pl.pallas_call(
        graph_layer_kernel,
        out_shape=jax.ShapeDtypeStruct((2, np_, gp), f32),
        grid_spec=pltpu.PrefetchScalarGridSpec(
            num_scalar_prefetch=0,
            grid=grid,
            in_specs=in_specs,
            out_specs=out_specs,
            scratch_shapes=[pltpu.VMEM((tm, c), jnp.float32)],
        ),
        compiler_params=pltpu.CompilerParams(
            dimension_semantics=("parallel", "arbitrary"),
            vmem_limit_bytes=vmem_limit,
        ),
        cost_estimate=pl.CostEstimate(
            flops=flops, transcendentals=0, bytes_accessed=bytes_accessed),
    )(adj_p, cx_p, nx_p, cemb_p, nemb_p,
      cx_p, nx_p, cemb_p, nemb_p, wt_p, b_p)

    co = out[0, :n, :g]
    no = out[1, :n, :g]
    return co, no


def graph_layer_ref(code_x, neighbor, c_embeddings, n_embeddings, adj, w, b):
    cx = code_x[:, None]
    nx = neighbor[:, None]
    ce = cx * c_embeddings
    ne = nx * n_embeddings
    cc = cx * (adj @ ce)
    cn = cx * (adj @ ne)
    nn_ = nx * (adj @ ne)
    nc = nx * (adj @ ce)
    co = (ce + cc + cn) @ w.T + b
    no = (ne + nn_ + nc) @ w.T + b
    return _leaky_relu(co), _leaky_relu(no)


if __name__ == "__main__":
    def run_case(key, N, CODE_SIZE, GRAPH_SIZE, **kw):
        k_adj, k_cx, k_nx, k_ce, k_ne, k_w, k_b = jax.random.split(key, 7)
        adj = jax.random.bernoulli(k_adj, 0.3, (N, N)).astype(jnp.float32)
        code_x = jax.random.bernoulli(k_cx, 0.5, (N,)).astype(jnp.float32)
        neighbor = jax.random.bernoulli(k_nx, 0.5, (N,)).astype(jnp.float32)
        c_embeddings = jax.random.normal(k_ce, (N, CODE_SIZE), jnp.float32)
        n_embeddings = jax.random.normal(k_ne, (N, CODE_SIZE), jnp.float32)
        # nn.Linear(code_size, graph_size) parameters, deterministic init.
        bound = 1.0 / (CODE_SIZE ** 0.5)
        w = jax.random.uniform(k_w, (GRAPH_SIZE, CODE_SIZE), jnp.float32, -bound, bound)
        b = jax.random.uniform(k_b, (GRAPH_SIZE,), jnp.float32, -bound, bound)

        co, no = graph_layer(code_x, neighbor, c_embeddings, n_embeddings,
                             adj, w, b, **kw)
        jax.block_until_ready((co, no))

        co_ref, no_ref = graph_layer_ref(code_x, neighbor, c_embeddings,
                                         n_embeddings, adj, w, b)
        assert co.shape == (N, GRAPH_SIZE) and no.shape == (N, GRAPH_SIZE)
        assert jnp.allclose(co, co_ref, rtol=1e-4, atol=1e-4)
        assert jnp.allclose(no, no_ref, rtol=1e-4, atol=1e-4)

    key = jax.random.PRNGKey(0)
    k1, k2 = jax.random.split(key)

    # Small shape consistent with the module (single-tile grid).
    run_case(k1, 16, 32, 32, adj_bf16=True)
    # Exercise the tiled (row, k) grid, accumulator carry and padding (3x3 grid).
    run_case(k2, 272, 32, 48, adj_bf16=True, tm_max=128, tk_max=128)

    print("KERNEL_OK")
</pallas_src>

<mosaic_0001>
module attributes {stable_mosaic.version = 11 : i64} {
  func.func @graph_layer_kernel(%arg0: i32, %arg1: i32, %arg2: memref<128x128xbf16, #tpu.memory_space<vmem>>, %arg3: memref<128x1xf32, #tpu.memory_space<vmem>>, %arg4: memref<128x1xf32, #tpu.memory_space<vmem>>, %arg5: memref<128x32xf32, #tpu.memory_space<vmem>>, %arg6: memref<128x32xf32, #tpu.memory_space<vmem>>, %arg7: memref<128x1xf32, #tpu.memory_space<vmem>>, %arg8: memref<128x1xf32, #tpu.memory_space<vmem>>, %arg9: memref<128x32xf32, #tpu.memory_space<vmem>>, %arg10: memref<128x32xf32, #tpu.memory_space<vmem>>, %arg11: memref<32x128xf32, #tpu.memory_space<vmem>>, %arg12: memref<1x128xf32, #tpu.memory_space<vmem>>, %arg13: memref<2x128x128xf32, #tpu.memory_space<vmem>>, %arg14: memref<128x32xf32, #tpu.memory_space<vmem>>) attributes {dimension_semantics = [#tpu.dimension_semantics<parallel>, #tpu.dimension_semantics<arbitrary>], iteration_bounds = array<i64: 1, 1>, scalar_prefetch = 0 : i64, scratch_operands = 1 : i64, tpu.core_type = #tpu.core_type<tc>, window_params = [{transform_indices = @transform_0, window_bounds = array<i64: 128, 128>}, {transform_indices = @transform_1, window_bounds = array<i64: 128, 1>}, {transform_indices = @transform_2, window_bounds = array<i64: 128, 1>}, {transform_indices = @transform_3, window_bounds = array<i64: 128, 32>}, {transform_indices = @transform_4, window_bounds = array<i64: 128, 32>}, {transform_indices = @transform_5, window_bounds = array<i64: 128, 1>}, {transform_indices = @transform_6, window_bounds = array<i64: 128, 1>}, {transform_indices = @transform_7, window_bounds = array<i64: 128, 32>}, {transform_indices = @transform_8, window_bounds = array<i64: 128, 32>}, {pipeline_mode = #tpu.pipeline_mode<synchronous>, transform_indices = @transform_9, window_bounds = array<i64: 32, 128>}, {pipeline_mode = #tpu.pipeline_mode<synchronous>, transform_indices = @transform_10, window_bounds = array<i64: 1, 128>}, {transform_indices = @transform_11, window_bounds = array<i64: 2, 128, 128>}]} {
    %c0_i32 = arith.constant 0 : i32
    %0 = arith.cmpi eq, %arg1, %c0_i32 : i32
    %1 = arith.extui %0 : i1 to i32
    %c0_i32_0 = arith.constant 0 : i32
    %2 = arith.cmpi ne, %1, %c0_i32_0 : i32
    scf.if %2 {
      %cst_16 = arith.constant 0.000000e+00 : f32
      %21 = vector.broadcast %cst_16 : f32 to vector<128x32xf32>
      %c0_17 = arith.constant 0 : index
      %c0_18 = arith.constant 0 : index
      %22 = vector.load %arg14[%c0_17, %c0_18] : memref<128x32xf32, #tpu.memory_space<vmem>>, vector<128x32xf32>
      tpu.vector_store %arg14[%c0_17, %c0_18], %21 {strides = array<i32>} : memref<128x32xf32, #tpu.memory_space<vmem>>, vector<128x32xf32>,
    } else {
    }
    %c0 = arith.constant 0 : index
    %c0_1 = arith.constant 0 : index
    %3 = vector.load %arg3[%c0, %c0_1] : memref<128x1xf32, #tpu.memory_space<vmem>>, vector<128x1xf32>
    %c0_2 = arith.constant 0 : index
    %c0_3 = arith.constant 0 : index
    %4 = vector.load %arg5[%c0_2, %c0_3] : memref<128x32xf32, #tpu.memory_space<vmem>>, vector<128x32xf32>
    %5 = vector.broadcast %3 : vector<128x1xf32> to vector<128x32xf32>
    %6 = arith.mulf %5, %4 : vector<128x32xf32>
    %c0_4 = arith.constant 0 : index
    %c0_5 = arith.constant 0 : index
    %7 = vector.load %arg4[%c0_4, %c0_5] : memref<128x1xf32, #tpu.memory_space<vmem>>, vector<128x1xf32>
    %c0_6 = arith.constant 0 : index
    %c0_7 = arith.constant 0 : index
    %8 = vector.load %arg6[%c0_6, %c0_7] : memref<128x32xf32, #tpu.memory_space<vmem>>, vector<128x32xf32>
    %9 = vector.broadcast %7 : vector<128x1xf32> to vector<128x32xf32>
    %10 = arith.mulf %9, %8 : vector<128x32xf32>
    %11 = arith.addf %6, %10 : vector<128x32xf32>
    %c0_8 = arith.constant 0 : index
    %c0_9 = arith.constant 0 : index
    %12 = vector.load %arg2[%c0_8, %c0_9] : memref<128x128xbf16, #tpu.memory_space<vmem>>, vector<128x128xbf16>
    %13 = arith.extf %12 : vector<128x128xbf16> to vector<128x128xf32>
    %c0_10 = arith.constant 0 : index
    %c0_11 = arith.constant 0 : index
    %14 = vector.load %arg14[%c0_10, %c0_11] : memref<128x32xf32, #tpu.memory_space<vmem>>, vector<128x32xf32>
    %cst = arith.constant dense<0.000000e+00> : vector<128x32xf32>
    %15 = tpu.matmul %13, %11, %cst {dimension_numbers = #tpu.dot_dimension_numbers<[1], [0], [0], [1], [0, 0, 1, 1], [], []>} : vector<128x128xf32>, vector<128x32xf32>, vector<128x32xf32> -> vector<128x32xf32>
    %16 = arith.addf %14, %15 : vector<128x32xf32>
    %c0_12 = arith.constant 0 : index
    %c0_13 = arith.constant 0 : index
    %17 = vector.load %arg14[%c0_12, %c0_13] : memref<128x32xf32, #tpu.memory_space<vmem>>, vector<128x32xf32>
    tpu.vector_store %arg14[%c0_12, %c0_13], %16 {strides = array<i32>} : memref<128x32xf32, #tpu.memory_space<vmem>>, vector<128x32xf32>,
    %c0_i32_14 = arith.constant 0 : i32
    %18 = arith.cmpi eq, %arg1, %c0_i32_14 : i32
    %19 = arith.extui %18 : i1 to i32
    %c0_i32_15 = arith.constant 0 : i32
    %20 = arith.cmpi ne, %19, %c0_i32_15 : i32
    scf.if %20 {
      %c0_16 = arith.constant 0 : index
      %c0_17 = arith.constant 0 : index
      %21 = vector.load %arg14[%c0_16, %c0_17] : memref<128x32xf32, #tpu.memory_space<vmem>>, vector<128x32xf32>
      %c0_18 = arith.constant 0 : index
      %c0_19 = arith.constant 0 : index
      %22 = vector.load %arg7[%c0_18, %c0_19] : memref<128x1xf32, #tpu.memory_space<vmem>>, vector<128x1xf32>
      %c0_20 = arith.constant 0 : index
      %c0_21 = arith.constant 0 : index
      %23 = vector.load %arg8[%c0_20, %c0_21] : memref<128x1xf32, #tpu.memory_space<vmem>>, vector<128x1xf32>
      %c0_22 = arith.constant 0 : index
      %c0_23 = arith.constant 0 : index
      %24 = vector.load %arg9[%c0_22, %c0_23] : memref<128x32xf32, #tpu.memory_space<vmem>>, vector<128x32xf32>
      %25 = vector.broadcast %22 : vector<128x1xf32> to vector<128x32xf32>
      %26 = arith.mulf %25, %24 : vector<128x32xf32>
      %c0_24 = arith.constant 0 : index
      %c0_25 = arith.constant 0 : index
      %27 = vector.load %arg10[%c0_24, %c0_25] : memref<128x32xf32, #tpu.memory_space<vmem>>, vector<128x32xf32>
      %28 = vector.broadcast %23 : vector<128x1xf32> to vector<128x32xf32>
      %29 = arith.mulf %28, %27 : vector<128x32xf32>
      %30 = vector.broadcast %22 : vector<128x1xf32> to vector<128x32xf32>
      %31 = arith.mulf %30, %21 : vector<128x32xf32>
      %32 = arith.addf %26, %31 : vector<128x32xf32>
      %33 = vector.broadcast %23 : vector<128x1xf32> to vector<128x32xf32>
      %34 = arith.mulf %33, %21 : vector<128x32xf32>
      %35 = arith.addf %29, %34 : vector<128x32xf32>
      %36 = tpu.concatenate %32, %35 in 0 : vector<128x32xf32>, vector<128x32xf32> -> vector<256x32xf32>
      %c0_26 = arith.constant 0 : index
      %c0_27 = arith.constant 0 : index
      %37 = vector.load %arg11[%c0_26, %c0_27] : memref<32x128xf32, #tpu.memory_space<vmem>>, vector<32x128xf32>
      %cst_28 = arith.constant dense<0.000000e+00> : vector<256x128xf32>
      %38 = tpu.matmul %36, %37, %cst_28 {dimension_numbers = #tpu.dot_dimension_numbers<[1], [0], [0], [1], [0, 0, 1, 1], [], []>} : vector<256x32xf32>, vector<32x128xf32>, vector<256x128xf32> -> vector<256x128xf32>
      %c0_29 = arith.constant 0 : index
      %c0_30 = arith.constant 0 : index
      %39 = vector.load %arg12[%c0_29, %c0_30] : memref<1x128xf32, #tpu.memory_space<vmem>>, vector<1x128xf32>
      %40 = vector.broadcast %39 : vector<1x128xf32> to vector<256x128xf32>
      %41 = arith.addf %38, %40 : vector<256x128xf32>
      %cst_31 = arith.constant 0.000000e+00 : f32
      %42 = vector.broadcast %cst_31 : f32 to vector<256x128xf32>
      %43 = arith.cmpf ogt, %41, %42 : vector<256x128xf32>
      %cst_32 = arith.constant 0.00999999977 : f32
      %44 = vector.broadcast %cst_32 : f32 to vector<256x128xf32>
      %45 = arith.mulf %44, %41 : vector<256x128xf32>
      %46 = arith.select %43, %41, %45 : vector<256x128xi1>, vector<256x128xf32>
      %47 = vector.extract_strided_slice %46 {offsets = [0, 0], sizes = [128, 128], strides = [1, 1]} : vector<256x128xf32> to vector<128x128xf32>
      %c0_33 = arith.constant 0 : index
      %c0_34 = arith.constant 0 : index
      %c0_35 = arith.constant 0 : index
      %48 = vector.load %arg13[%c0_33, %c0_34, %c0_35] : memref<2x128x128xf32, #tpu.memory_space<vmem>>, vector<1x128x128xf32>
      %49 = vector.shape_cast %48 : vector<1x128x128xf32> to vector<128x128xf32>
      %50 = vector.shape_cast %47 : vector<128x128xf32> to vector<1x128x128xf32>
      tpu.vector_store %arg13[%c0_33, %c0_34, %c0_35], %50 {strides = array<i32>} : memref<2x128x128xf32, #tpu.memory_space<vmem>>, vector<1x128x128xf32>,
      %51 = vector.extract_strided_slice %46 {offsets = [128, 0], sizes = [128, 128], strides = [1, 1]} : vector<256x128xf32> to vector<128x128xf32>
      %c1 = arith.constant 1 : index
      %c0_36 = arith.constant 0 : index
      %c0_37 = arith.constant 0 : index
      %52 = vector.load %arg13[%c1, %c0_36, %c0_37] : memref<2x128x128xf32, #tpu.memory_space<vmem>>, vector<1x128x128xf32>
      %53 = vector.shape_cast %52 : vector<1x128x128xf32> to vector<128x128xf32>
      %54 = vector.shape_cast %51 : vector<128x128xf32> to vector<1x128x128xf32>
      tpu.vector_store %arg13[%c1, %c0_36, %c0_37], %54 {strides = array<i32>} : memref<2x128x128xf32, #tpu.memory_space<vmem>>, vector<1x128x128xf32>,
    } else {
    }
    return
  }
  func.func @transform_0(%arg0: i32, %arg1: i32) -> (i32, i32) {
    %c0_i32 = arith.constant 0 : i32
    return %arg0, %arg1 : i32, i32
  }
  func.func @transform_1(%arg0: i32, %arg1: i32) -> (i32, i32) {
    %c0_i32 = arith.constant 0 : i32
    %c0_i32_0 = arith.constant 0 : i32
    return %arg1, %c0_i32 : i32, i32
  }
  func.func @transform_2(%arg0: i32, %arg1: i32) -> (i32, i32) {
    %c0_i32 = arith.constant 0 : i32
    %c0_i32_0 = arith.constant 0 : i32
    return %arg1, %c0_i32 : i32, i32
  }
  func.func @transform_3(%arg0: i32, %arg1: i32) -> (i32, i32) {
    %c0_i32 = arith.constant 0 : i32
    %c0_i32_0 = arith.constant 0 : i32
    return %arg1, %c0_i32 : i32, i32
  }
  func.func @transform_4(%arg0: i32, %arg1: i32) -> (i32, i32) {
    %c0_i32 = arith.constant 0 : i32
    %c0_i32_0 = arith.constant 0 : i32
    return %arg1, %c0_i32 : i32, i32
  }
  func.func @transform_5(%arg0: i32, %arg1: i32) -> (i32, i32) {
    %c0_i32 = arith.constant 0 : i32
    %c0_i32_0 = arith.constant 0 : i32
    return %arg0, %c0_i32 : i32, i32
  }
  func.func @transform_6(%arg0: i32, %arg1: i32) -> (i32, i32) {
    %c0_i32 = arith.constant 0 : i32
    %c0_i32_0 = arith.constant 0 : i32
    return %arg0, %c0_i32 : i32, i32
  }
  func.func @transform_7(%arg0: i32, %arg1: i32) -> (i32, i32) {
    %c0_i32 = arith.constant 0 : i32
    %c0_i32_0 = arith.constant 0 : i32
    return %arg0, %c0_i32 : i32, i32
  }
  func.func @transform_8(%arg0: i32, %arg1: i32) -> (i32, i32) {
    %c0_i32 = arith.constant 0 : i32
    %c0_i32_0 = arith.constant 0 : i32
    return %arg0, %c0_i32 : i32, i32
  }
  func.func @transform_9(%arg0: i32, %arg1: i32) -> (i32, i32) {
    %c0_i32 = arith.constant 0 : i32
    %c0_i32_0 = arith.constant 0 : i32
    %c0_i32_1 = arith.constant 0 : i32
    return %c0_i32, %c0_i32_0 : i32, i32
  }
  func.func @transform_10(%arg0: i32, %arg1: i32) -> (i32, i32) {
    %c0_i32 = arith.constant 0 : i32
    %c0_i32_0 = arith.constant 0 : i32
    %c0_i32_1 = arith.constant 0 : i32
    return %c0_i32, %c0_i32_0 : i32, i32
  }
  func.func @transform_11(%arg0: i32, %arg1: i32) -> (i32, i32, i32) {
    %c0_i32 = arith.constant 0 : i32
    %c0_i32_0 = arith.constant 0 : i32
    %c0_i32_1 = arith.constant 0 : i32
    return %c0_i32, %arg0, %c0_i32_0 : i32, i32, i32
  }
}

</mosaic_0001>

<bundles_post_ra>
// kernel: tpu_custom_call.1
= control target key start
LH: loop header
LB: loop body
LE: loop exit
PB: predicated region body
PF: predicated region fallthrough
CT: control target
= control target key end

     0   :  { %v1701_v2 = vmov 0   ;;  %s2459_s0 = inlined_call_operand.vmem [shape: bf16[128,128], index: 0, kind: input, shape index: {}]   ;;  %s2460_s1 = inlined_call_operand.vmem [shape: f32[128,1], index: 1, kind: input, shape index: {}]   ;;  %s2461_s2 = inlined_call_operand.vmem [shape: f32[128,1], index: 2, kind: input, shape index: {}]   ;;  %s2462_s3 = inlined_call_operand.vmem [shape: f32[128,32], index: 3, kind: input, shape index: {}]   ;;  %s2463_s4 = inlined_call_operand.vmem [shape: f32[128,32], index: 4, kind: input, shape index: {}]   ;;  %s2464_s5 = inlined_call_operand.vmem [shape: f32[128,1], index: 5, kind: input, shape index: {}]   ;;  %s2465_s6 = inlined_call_operand.vmem [shape: f32[128,1], index: 6, kind: input, shape index: {}]   ;;  %s2466_s7 = inlined_call_operand.vmem [shape: f32[128,32], index: 7, kind: input, shape index: {}]   ;;  %s2467_s8 = inlined_call_operand.vmem [shape: f32[128,32], index: 8, kind: input, shape index: {}]   ;;  %s2468_s9 = inlined_call_operand.vmem [shape: f32[32,128], index: 9, kind: input, shape index: {}]   ;;  %s2469_s10 = inlined_call_operand.vmem [shape: f32[1,128], index: 10, kind: input, shape index: {}]   ;;  %s2470_s11 = inlined_call_operand.hbm [shape: f32[2,128,128], index: 11, kind: output, shape index: {}]  }
   0x1   :  { %v188_v0 = vld [vmem:[%s2461_s2] sm:$0xff]  ;;  %1676 = vset.pattern.permute.xlu1 %v1701_v2  ;;  %1675 = vset.pattern.permute.xlu0 %v1701_v2  ;;  %v189_v3 = vld [vmem:[%s2461_s2 + $0x8] sm:$0xff]  ;;  %v63_v5 = vld [vmem:[%s2460_s1 + $0x18] sm:$0xff] }
   0x2   :  { %v60_v1 = vld [vmem:[%s2460_s1] sm:$0xff]  ;;  %222 = vperm.xlu1 %1676, %v188_v0   ;;  %v61_v4 = vld [vmem:[%s2460_s1 + $0x8] sm:$0xff]  ;;  %v62_v6 = vld [vmem:[%s2460_s1 + $0x10] sm:$0xff] }
   0x3   :  { %94 = vperm.xlu0 %1675, %v60_v1   ;;  %v191_v7 = vld [vmem:[%s2461_s2 + $0x18] sm:$0xff]  ;;  %v190_v8 = vld [vmem:[%s2461_s2 + $0x10] sm:$0xff]  ;;  %v65_v9 = vld [vmem:[%s2460_s1 + $0x28] sm:$0xff] }
   0x4   :  { %v64_v10 = vld [vmem:[%s2460_s1 + $0x20] sm:$0xff]  ;;  %v193_v11 = vld [vmem:[%s2461_s2 + $0x28] sm:$0xff]  ;;  %v67_v13 = vld [vmem:[%s2460_s1 + $0x38] sm:$0xff] }
   0x5   :  { %v192_v12 = vld [vmem:[%s2461_s2 + $0x20] sm:$0xff]  ;;  %v66_v14 = vld [vmem:[%s2460_s1 + $0x30] sm:$0xff] }
   0x6   :  { %227 = vperm.xlu1 %1676, %v189_v3  }
   0x7   :  { %99 = vperm.xlu0 %1675, %v61_v4  }
   0xa   :  { %109 = vperm.xlu1 %1676, %v63_v5  }
   0xb   :  { %104 = vperm.xlu0 %1675, %v62_v6  }
   0xe   :  { %237 = vperm.xlu1 %1676, %v191_v7  }
   0xf   :  { %232 = vperm.xlu0 %1675, %v190_v8  }
  0x12   :  { %119 = vperm.xlu1 %1676, %v65_v9  }
  0x13   :  { %114 = vperm.xlu0 %1675, %v64_v10  }
  0x16   :  { %247 = vperm.xlu1 %1676, %v193_v11  }
  0x17   :  { %242 = vperm.xlu0 %1675, %v192_v12  }
  0x1a   :  { %129 = vperm.xlu1 %1676, %v67_v13  }
  0x1b   :  { %124 = vperm.xlu0 %1675, %v66_v14  }
  0x1c   :  { %16 = vsyncpa [#allocation4], 0  ;;  %v195_v15 = vld [vmem:[%s2461_s2 + $0x38] sm:$0xff]  ;;  %v194_v16 = vld [vmem:[%s2461_s2 + $0x30] sm:$0xff]  ;;  %vm43_vm0 = vcmask 261120   ;;  %v1702_v3 = vmov 0.0  }
  0x1d   :  { %v69_v17 = vld [vmem:[%s2460_s1 + $0x48] sm:$0xff]  ;;  %v68_v18 = vld [vmem:[%s2460_s1 + $0x40] sm:$0xff]  ;;  %v71_v21 = vld [vmem:[%s2460_s1 + $0x58] sm:$0xff]  ;;  %45 = vst.msk [vmem:[#allocation2 + $0x8] sm:$0xff] %vm43_vm0, %v1702_v3 }
  0x1e   :  { %257 = vperm.xlu1 %1676, %v195_v15   ;;  %v197_v19 = vld [vmem:[%s2461_s2 + $0x48] sm:$0xff]  ;;  %v196_v20 = vld [vmem:[%s2461_s2 + $0x40] sm:$0xff]  ;;  %v70_v22 = vld [vmem:[%s2460_s1 + $0x50] sm:$0xff]  ;;  %44 = vst.msk [vmem:[#allocation2] sm:$0xff] %vm43_vm0, %v1702_v3 }
  0x1f   :  { %252 = vperm.xlu0 %1675, %v194_v16   ;;  %v199_v23 = vld [vmem:[%s2461_s2 + $0x58] sm:$0xff]  ;;  %v198_v24 = vld [vmem:[%s2461_s2 + $0x50] sm:$0xff]  ;;  %v73_v25 = vld [vmem:[%s2460_s1 + $0x68] sm:$0xff]  ;;  %46 = vst.msk [vmem:[#allocation2 + $0x10] sm:$0xff] %vm43_vm0, %v1702_v3 }
  0x20   :  { %v72_v26 = vld [vmem:[%s2460_s1 + $0x60] sm:$0xff]  ;;  %v201_v27 = vld [vmem:[%s2461_s2 + $0x68] sm:$0xff]  ;;  %v75_v29 = vld [vmem:[%s2460_s1 + $0x78] sm:$0xff]  ;;  %47 = vst.msk [vmem:[#allocation2 + $0x18] sm:$0xff] %vm43_vm0, %v1702_v3 }
  0x21   :  { %v200_v28 = vld [vmem:[%s2461_s2 + $0x60] sm:$0xff]  ;;  %v74_v30 = vld [vmem:[%s2460_s1 + $0x70] sm:$0xff]  ;;  %v203_v31 = vld [vmem:[%s2461_s2 + $0x78] sm:$0xff]  ;;  %48 = vst.msk [vmem:[#allocation2 + $0x20] sm:$0xff] %vm43_vm0, %v1702_v3 }
  0x22   :  { %139 = vperm.xlu1 %1676, %v69_v17   ;;  %v202_v32 = vld [vmem:[%s2461_s2 + $0x70] sm:$0xff]  ;;  %v580_v33 = vld [vmem:[%s2464_s5 + $0x18] sm:$0xff]  ;;  %v582_v35 = vld [vmem:[%s2464_s5 + $0x28] sm:$0xff]  ;;  %49 = vst.msk [vmem:[#allocation2 + $0x28] sm:$0xff] %vm43_vm0, %v1702_v3 }
  0x23   :  { %134 = vperm.xlu0 %1675, %v68_v18   ;;  %v579_v34 = vld [vmem:[%s2464_s5 + $0x10] sm:$0xff]  ;;  %v581_v36 = vld [vmem:[%s2464_s5 + $0x20] sm:$0xff]  ;;  %v584_v39 = vld [vmem:[%s2464_s5 + $0x38] sm:$0xff]  ;;  %50 = vst.msk [vmem:[#allocation2 + $0x30] sm:$0xff] %vm43_vm0, %v1702_v3 }
  0x24   :  { %v1877_v37 = vld [vmem:[%s2459_s0] sm:$0xff]   ;;  %v583_v40 = vld [vmem:[%s2464_s5 + $0x30] sm:$0xff]  ;;  %v586_v41 = vld [vmem:[%s2464_s5 + $0x48] sm:$0xff]  ;;  %51 = vst.msk [vmem:[#allocation2 + $0x38] sm:$0xff] %vm43_vm0, %v1702_v3 }
  0x25   :  { %v1409_v38 = vunpack.c.l.bf16 %v1877_v37  ;;  %v585_v42 = vld [vmem:[%s2464_s5 + $0x40] sm:$0xff]  ;;  %v588_v43 = vld [vmem:[%s2464_s5 + $0x58] sm:$0xff]  ;;  %v587_v44 = vld [vmem:[%s2464_s5 + $0x50] sm:$0xff]  ;;  %52 = vst.msk [vmem:[#allocation2 + $0x40] sm:$0xff] %vm43_vm0, %v1702_v3 }
  0x26   :  { %267 = vperm.xlu1 %1676, %v197_v19   ;;  %v590_v45 = vld [vmem:[%s2464_s5 + $0x68] sm:$0xff]  ;;  %v589_v46 = vld [vmem:[%s2464_s5 + $0x60] sm:$0xff]  ;;  %v592_v47 = vld [vmem:[%s2464_s5 + $0x78] sm:$0xff]  ;;  %53 = vst.msk [vmem:[#allocation2 + $0x48] sm:$0xff] %vm43_vm0, %v1702_v3 }
  0x27   :  { %262 = vperm.xlu0 %1675, %v196_v20   ;;  %1546 = vmatprep.mubr.f32.mxu0 %v1409_v38  ;;  %v591_v48 = vld [vmem:[%s2464_s5 + $0x70] sm:$0xff]  ;;  %v594_v49 = vld [vmem:[%s2465_s6 + $0x8] sm:$0xff]  ;;  %v593_v50 = vld [vmem:[%s2465_s6] sm:$0xff]  ;;  %54 = vst.msk [vmem:[#allocation2 + $0x50] sm:$0xff] %vm43_vm0, %v1702_v3 }
  0x28   :  { %v596_v51 = vld [vmem:[%s2465_s6 + $0x18] sm:$0xff]  ;;  %v595_v52 = vld [vmem:[%s2465_s6 + $0x10] sm:$0xff]  ;;  %v598_v53 = vld [vmem:[%s2465_s6 + $0x28] sm:$0xff]  ;;  %55 = vst.msk [vmem:[#allocation2 + $0x58] sm:$0xff] %vm43_vm0, %v1702_v3 }
  0x29   :  { %v597_v54 = vld [vmem:[%s2465_s6 + $0x20] sm:$0xff]  ;;  %v600_v55 = vld [vmem:[%s2465_s6 + $0x38] sm:$0xff]  ;;  %v599_v56 = vld [vmem:[%s2465_s6 + $0x30] sm:$0xff]  ;;  %56 = vst.msk [vmem:[#allocation2 + $0x60] sm:$0xff] %vm43_vm0, %v1702_v3 }
  0x2a   :  { %149 = vperm.xlu1 %1676, %v71_v21   ;;  %v602_v57 = vld [vmem:[%s2465_s6 + $0x48] sm:$0xff]  ;;  %v601_v58 = vld [vmem:[%s2465_s6 + $0x40] sm:$0xff]  ;;  %v604_v59 = vld [vmem:[%s2465_s6 + $0x58] sm:$0xff]  ;;  %57 = vst.msk [vmem:[#allocation2 + $0x68] sm:$0xff] %vm43_vm0, %v1702_v3 }
  0x2b   :  { %144 = vperm.xlu0 %1675, %v70_v22   ;;  %v603_v60 = vld [vmem:[%s2465_s6 + $0x50] sm:$0xff]  ;;  %v606_v61 = vld [vmem:[%s2465_s6 + $0x68] sm:$0xff]  ;;  %v605_v62 = vld [vmem:[%s2465_s6 + $0x60] sm:$0xff]  ;;  %58 = vst.msk [vmem:[#allocation2 + $0x70] sm:$0xff] %vm43_vm0, %v1702_v3 }
  0x2c   :  { %v607_v63 = vld [vmem:[%s2465_s6 + $0x70] sm:$0xff]  ;;  %v577_v0 = vld [vmem:[%s2464_s5] sm:$0xff]  ;;  %v608_v1 = vld [vmem:[%s2465_s6 + $0x78] sm:$0xff]  ;;  %59 = vst.msk [vmem:[#allocation2 + $0x78] sm:$0xff] %vm43_vm0, %v1702_v3 }
  0x2d   :  { %v578_v2 = vld [vmem:[%s2464_s5 + $0x8] sm:$0xff]  ;;  %v204_v4 = vld [vmem:[%s2463_s4] sm:$0xff]  ;;  %v79_v20 = vld [vmem:[%s2462_s3 + $0x18] sm:$0xff] }
  0x2e   :  { %277 = vperm.xlu1 %1676, %v199_v23   ;;  %v76_v6 = vld [vmem:[%s2462_s3] sm:$0xff]  ;;  %v205_v8 = vld [vmem:[%s2463_s4 + $0x8] sm:$0xff]  ;;  %v78_v22 = vld [vmem:[%s2462_s3 + $0x10] sm:$0xff] }
  0x2f   :  { %272 = vperm.xlu0 %1675, %v198_v24   ;;  %v77_v9 = vld [vmem:[%s2462_s3 + $0x8] sm:$0xff]  ;;  %v207_v23 = vld [vmem:[%s2463_s4 + $0x18] sm:$0xff]  ;;  %v206_v24 = vld [vmem:[%s2463_s4 + $0x10] sm:$0xff] }
  0x30   :  { %v80_v38 = vld [vmem:[%s2462_s3 + $0x20] sm:$0xff] }
  0x32   :  { %159 = vperm.xlu1 %1676, %v73_v25  }
  0x33   :  { %154 = vperm.xlu0 %1675, %v72_v26  }
  0x36   :  { %287 = vperm.xlu1 %1676, %v201_v27  }
  0x37   :  { %282 = vperm.xlu0 %1675, %v200_v28  }
  0x3a   :  { %169 = vperm.xlu1 %1676, %v75_v29  }
  0x3b   :  { %164 = vperm.xlu0 %1675, %v74_v30  }
  0x3e   :  { %297 = vperm.xlu1 %1676, %v203_v31  }
  0x3f   :  { %292 = vperm.xlu0 %1675, %v202_v32  }
  0x42   :  { %642 = vperm.xlu1 %1676, %v580_v33  }
  0x43   :  { %637 = vperm.xlu0 %1675, %v579_v34  }
  0x46   :  { %652 = vperm.xlu1 %1676, %v582_v35   ;;  %v81_v35 = vld [vmem:[%s2462_s3 + $0x28] sm:$0xff] }
  0x47   :  { %647 = vperm.xlu0 %1675, %v581_v36  }
  0x4a   :  { %662 = vperm.xlu1 %1676, %v584_v39   ;;  %v209_v39 = vld [vmem:[%s2463_s4 + $0x28] sm:$0xff] }
  0x4b   :  { %657 = vperm.xlu0 %1675, %v583_v40   ;;  %v208_v40 = vld [vmem:[%s2463_s4 + $0x20] sm:$0xff] }
  0x4e   :  { %672 = vperm.xlu1 %1676, %v586_v41  }
  0x4f   :  { %667 = vperm.xlu0 %1675, %v585_v42  }
  0x52   :  { %682 = vperm.xlu1 %1676, %v588_v43  }
  0x53   :  { %677 = vperm.xlu0 %1675, %v587_v44  }
  0x56   :  { %692 = vperm.xlu1 %1676, %v590_v45  }
  0x57   :  { %687 = vperm.xlu0 %1675, %v589_v46  }
  0x5a   :  { %702 = vperm.xlu1 %1676, %v592_v47  }
  0x5b   :  { %697 = vperm.xlu0 %1675, %v591_v48  }
  0x5e   :  { %744 = vperm.xlu1 %1676, %v594_v49  }
  0x5f   :  { %739 = vperm.xlu0 %1675, %v593_v50  }
  0x62   :  { %754 = vperm.xlu1 %1676, %v596_v51   ;;  %v83_v51 = vld [vmem:[%s2462_s3 + $0x38] sm:$0xff] }
  0x63   :  { %749 = vperm.xlu0 %1675, %v595_v52  }
  0x66   :  { %764 = vperm.xlu1 %1676, %v598_v53   ;;  %v82_v53 = vld [vmem:[%s2462_s3 + $0x30] sm:$0xff] }
  0x67   :  { %759 = vperm.xlu0 %1675, %v597_v54   ;;  %v211_v54 = vld [vmem:[%s2463_s4 + $0x38] sm:$0xff] }
  0x6a   :  { %774 = vperm.xlu1 %1676, %v600_v55   ;;  %v210_v55 = vld [vmem:[%s2463_s4 + $0x30] sm:$0xff] }
  0x6b   :  { %769 = vperm.xlu0 %1675, %v599_v56  }
  0x6e   :  { %784 = vperm.xlu1 %1676, %v602_v57  }
  0x6f   :  { %779 = vperm.xlu0 %1675, %v601_v58  }
  0x72   :  { %794 = vperm.xlu1 %1676, %v604_v59  }
  0x73   :  { %789 = vperm.xlu0 %1675, %v603_v60  }
  0x76   :  { %804 = vperm.xlu1 %1676, %v606_v61  }
  0x77   :  { %799 = vperm.xlu0 %1675, %v605_v62  }
  0x7a   :  { %809 = vperm.xlu1 %1676, %v607_v63  }
  0x7b   :  { %627 = vperm.xlu0 %1675, %v577_v0  }
  0x7e   :  { %814 = vperm.xlu1 %1676, %v608_v1  }
  0x7f   :  { %632 = vperm.xlu0 %1675, %v578_v2   ;;  %v85_v2 = vld [vmem:[%s2462_s3 + $0x48] sm:$0xff] }
  0x81   :  { %v223_v5 = vpop.permute.xlu1 %222 }
  0x82   :  { %v95_v7 = vpop.permute.xlu0 %94  ;;  %v300_v10 = vmul.f32 %v223_v5, %v204_v4  ;;  %v84_v4 = vld [vmem:[%s2462_s3 + $0x40] sm:$0xff]  ;;  %v213_v5 = vld [vmem:[%s2463_s4 + $0x48] sm:$0xff] }
  0x83   :  { %v172_v11 = vmul.f32 %v95_v7, %v76_v6  ;;  %v212_v6 = vld [vmem:[%s2463_s4 + $0x40] sm:$0xff] }
  0x85   :  { %v228_v12 = vpop.permute.xlu1 %227  ;;  %v316_v16 = vadd.f32 %v300_v10, %v172_v11 }
  0x86   :  { %v100_v13 = vpop.permute.xlu0 %99  ;;  %v301_v14 = vmul.f32 %v228_v12, %v205_v8 }
  0x87   :  { %v173_v15 = vmul.f32 %v100_v13, %v77_v9 }
  0x89   :  { %v317_v17 = vadd.f32 %v301_v14, %v173_v15  ;;  %v110_v18 = vpop.permute.xlu1 %109 }
  0x8a   :  { %v105_v19 = vpop.permute.xlu0 %104  ;;  %v175_v27 = vmul.f32 %v110_v18, %v79_v20  ;;  %v215_v20 = vld [vmem:[%s2463_s4 + $0x58] sm:$0xff] }
  0x8b   :  { %v1626_v21 = vpack.c.bf16 %v317_v17, %v316_v16  ;;  %v174_v28 = vmul.f32 %v105_v19, %v78_v22  ;;  %v87_v17 = vld [vmem:[%s2462_s3 + $0x58] sm:$0xff]  ;;  %v86_v19 = vld [vmem:[%s2462_s3 + $0x50] sm:$0xff] }
  0x8d   :  { %1627 = vmatprep.subr.bf16.mxu0 %v1626_v21  ;;  %v238_v25 = vpop.permute.xlu1 %237 }
  0x8e   :  { %1629 = vmatpush3.bf16.msra.mxu0 %v1626_v21  ;;  %v233_v26 = vpop.permute.xlu0 %232  ;;  %v303_v29 = vmul.f32 %v238_v25, %v207_v23  ;;  %v214_v21 = vld [vmem:[%s2463_s4 + $0x50] sm:$0xff] }
  0x8f   :  { %v302_v30 = vmul.f32 %v233_v26, %v206_v24 }
  0x90   :  { %v319_v31 = vadd.f32 %v303_v29, %v175_v27 }
  0x91   :  { %v318_v32 = vadd.f32 %v302_v30, %v174_v28  ;;  %v120_v33 = vpop.permute.xlu1 %119 }
  0x92   :  { %v115_v34 = vpop.permute.xlu0 %114  ;;  %v177_v43 = vmul.f32 %v120_v33, %v81_v35  ;;  %v217_v35 = vld [vmem:[%s2463_s4 + $0x68] sm:$0xff] }
  0x93   :  { %v1630_v36 = vpack.c.bf16 %v319_v31, %v318_v32  ;;  %v176_v44 = vmul.f32 %v115_v34, %v80_v38  ;;  %v89_v32 = vld [vmem:[%s2462_s3 + $0x68] sm:$0xff]  ;;  %v88_v34 = vld [vmem:[%s2462_s3 + $0x60] sm:$0xff] }
  0x95   :  { %1631 = vmatprep.subr.bf16.mxu0 %v1630_v36  ;;  %v248_v41 = vpop.permute.xlu1 %247 }
  0x96   :  { %1633 = vmatpush3.bf16.msra.mxu0 %v1630_v36  ;;  %v243_v42 = vpop.permute.xlu0 %242  ;;  %v305_v45 = vmul.f32 %v248_v41, %v209_v39  ;;  %v216_v36 = vld [vmem:[%s2463_s4 + $0x60] sm:$0xff] }
  0x97   :  { %v304_v46 = vmul.f32 %v243_v42, %v208_v40 }
  0x98   :  { %v321_v47 = vadd.f32 %v305_v45, %v177_v43 }
  0x99   :  { %v320_v48 = vadd.f32 %v304_v46, %v176_v44  ;;  %v130_v49 = vpop.permute.xlu1 %129 }
  0x9a   :  { %v125_v50 = vpop.permute.xlu0 %124  ;;  %v179_v58 = vmul.f32 %v130_v49, %v83_v51  ;;  %v219_v51 = vld [vmem:[%s2463_s4 + $0x78] sm:$0xff] }
  0x9b   :  { %v1634_v52 = vpack.c.bf16 %v321_v47, %v320_v48  ;;  %v178_v59 = vmul.f32 %v125_v50, %v82_v53  ;;  %v91_v48 = vld [vmem:[%s2462_s3 + $0x78] sm:$0xff]  ;;  %v90_v50 = vld [vmem:[%s2462_s3 + $0x70] sm:$0xff] }
  0x9d   :  { %1635 = vmatprep.subr.bf16.mxu0 %v1634_v52  ;;  %v258_v56 = vpop.permute.xlu1 %257 }
  0x9e   :  { %1637 = vmatpush3.bf16.msra.mxu0 %v1634_v52  ;;  %v253_v57 = vpop.permute.xlu0 %252  ;;  %v307_v60 = vmul.f32 %v258_v56, %v211_v54  ;;  %v218_v52 = vld [vmem:[%s2463_s4 + $0x70] sm:$0xff] }
  0x9f   :  { %v306_v61 = vmul.f32 %v253_v57, %v210_v55 }
  0xa0   :  { %v323_v62 = vadd.f32 %v307_v60, %v179_v58 }
  0xa1   :  { %v322_v63 = vadd.f32 %v306_v61, %v178_v59  ;;  %v140_v0 = vpop.permute.xlu1 %139 }
  0xa2   :  { %v135_v1 = vpop.permute.xlu0 %134  ;;  %v181_v9 = vmul.f32 %v140_v0, %v85_v2 }
  0xa3   :  { %v1638_v3 = vpack.c.bf16 %v323_v62, %v322_v63  ;;  %v180_v10 = vmul.f32 %v135_v1, %v84_v4  ;;  %v1439_v62 = vld [vmem:[%s2459_s0 + $0x8] sm:$0xff]   ;;  %v1410_v63 = vunpack.c.h.bf16 %v1877_v37  ;;  %v1440_v1 = vld [vmem:[%s2459_s0 + $0x10] sm:$0xff]   ;;  %v1441_v4 = vld [vmem:[%s2459_s0 + $0x18] sm:$0xff]  }
  0xa4   :  { %v1413_v0 = vunpack.c.l.bf16 %v1439_v62  ;;  %v1414_v2 = vunpack.c.h.bf16 %v1439_v62  ;;  %v1442_v37 = vld [vmem:[%s2459_s0 + $0x20] sm:$0xff]  }
  0xa5   :  { %1639 = vmatprep.subr.bf16.mxu0 %v1638_v3  ;;  %v268_v7 = vpop.permute.xlu1 %267 }
  0xa6   :  { %1641 = vmatpush3.bf16.msra.mxu0 %v1638_v3  ;;  %v263_v8 = vpop.permute.xlu0 %262  ;;  %v309_v11 = vmul.f32 %v268_v7, %v213_v5  ;;  %v1417_v3 = vunpack.c.l.bf16 %v1440_v1  ;;  %v1418_v5 = vunpack.c.h.bf16 %v1440_v1  ;;  %v1422_v7 = vunpack.c.h.bf16 %v1441_v4  ;;  %v610_v1 = vld [vmem:[%s2466_s7 + $0x8] sm:$0xff] }
  0xa7   :  { %v308_v12 = vmul.f32 %v263_v8, %v212_v6  ;;  %v1421_v6 = vunpack.c.l.bf16 %v1441_v4  ;;  %v1425_v8 = vunpack.c.l.bf16 %v1442_v37  ;;  %v371_v4 = vld [vmem:[#allocation2 + $0x38] sm:$0xff] }
  0xa8   :  { %v325_v13 = vadd.f32 %v309_v11, %v181_v9  ;;  %v1443_v9 = vld [vmem:[%s2459_s0 + $0x28] sm:$0xff]  }
  0xa9   :  { %v324_v14 = vadd.f32 %v308_v12, %v180_v10  ;;  %v150_v15 = vpop.permute.xlu1 %149  ;;  %v1426_v10 = vunpack.c.h.bf16 %v1442_v37  ;;  %v1429_v11 = vunpack.c.l.bf16 %v1443_v9  ;;  %v1444_v12 = vld [vmem:[%s2459_s0 + $0x30] sm:$0xff]  }
  0xaa   :  { %v145_v16 = vpop.permute.xlu0 %144  ;;  %v183_v24 = vmul.f32 %v150_v15, %v87_v17  ;;  %v1445_v15 = vld [vmem:[%s2459_s0 + $0x38] sm:$0xff]  }
  0xab   :  { %v1642_v18 = vpack.c.bf16 %v325_v13, %v324_v14  ;;  %v182_v25 = vmul.f32 %v145_v16, %v86_v19  ;;  %v1430_v13 = vunpack.c.h.bf16 %v1443_v9  ;;  %v1433_v14 = vunpack.c.l.bf16 %v1444_v12  ;;  %v897_v19 = vld [vmem:[%s2468_s9] sm:$0xff] }
  0xac   :  { %v1434_v16 = vunpack.c.h.bf16 %v1444_v12  ;;  %v1437_v17 = vunpack.c.l.bf16 %v1445_v15 }
  0xad   :  { %1643 = vmatprep.subr.bf16.mxu0 %v1642_v18  ;;  %v278_v22 = vpop.permute.xlu1 %277 }
  0xae   :  { %1645 = vmatpush3.bf16.msra.mxu0 %v1642_v18  ;;  %v273_v23 = vpop.permute.xlu0 %272  ;;  %v311_v26 = vmul.f32 %v278_v22, %v215_v20  ;;  %v1438_v18 = vunpack.c.h.bf16 %v1445_v15  ;;  %v898_v20 = vld [vmem:[%s2468_s9 + $0x8] sm:$0xff]  ;;  %v899_v22 = vld [vmem:[%s2468_s9 + $0x10] sm:$0xff]  ;;  %v612_v15 = vld [vmem:[%s2466_s7 + $0x18] sm:$0xff] }
  0xaf   :  { %v310_v27 = vmul.f32 %v273_v23, %v214_v21  ;;  %v1658_v21 = vpack.c.bf16 %v898_v20, %v897_v19  ;;  %v900_v23 = vld [vmem:[%s2468_s9 + $0x18] sm:$0xff]  ;;  %v372_v20 = vld [vmem:[#allocation2 + $0x40] sm:$0xff] }
  0xb0   :  { %v327_v28 = vadd.f32 %v311_v26, %v183_v24  ;;  %v1662_v24 = vpack.c.bf16 %v900_v23, %v899_v22 }
  0xb1   :  { %v326_v29 = vadd.f32 %v310_v27, %v182_v25  ;;  %v160_v30 = vpop.permute.xlu1 %159  ;;  %1666 = vmatprep.subr.bf16.mxu1 %v1658_v21 }
  0xb2   :  { %v155_v31 = vpop.permute.xlu0 %154  ;;  %v185_v40 = vmul.f32 %v160_v30, %v89_v32  ;;  %1668 = vmatpush3.bf16.msra.mxu1 %v1658_v21 }
  0xb3   :  { %v1646_v33 = vpack.c.bf16 %v327_v28, %v326_v29  ;;  %v184_v41 = vmul.f32 %v155_v31, %v88_v34  ;;  %1667 = vmatprep.subr.bf16.mxu1 %v1662_v24 }
  0xb5   :  { %1647 = vmatprep.subr.bf16.mxu0 %v1646_v33  ;;  %v288_v38 = vpop.permute.xlu1 %287 }
  0xb6   :  { %1649 = vmatpush3.bf16.msra.mxu0 %v1646_v33  ;;  %v283_v39 = vpop.permute.xlu0 %282  ;;  %v313_v42 = vmul.f32 %v288_v38, %v217_v35  ;;  %1669 = vmatpush3.bf16.msra.mxu1 %v1662_v24 }
  0xb7   :  { %v312_v43 = vmul.f32 %v283_v39, %v216_v36 }
  0xb8   :  { %v329_v44 = vadd.f32 %v313_v42, %v185_v40 }
  0xb9   :  { %v328_v45 = vadd.f32 %v312_v43, %v184_v41  ;;  %v170_v46 = vpop.permute.xlu1 %169 }
  0xba   :  { %v165_v47 = vpop.permute.xlu0 %164  ;;  %v187_v55 = vmul.f32 %v170_v46, %v91_v48 }
  0xbb   :  { %v1650_v49 = vpack.c.bf16 %v329_v44, %v328_v45  ;;  %v186_v56 = vmul.f32 %v165_v47, %v90_v50  ;;  %v365_v44 = vld [vmem:[#allocation2 + $0x8] sm:$0xff]  ;;  %v364_v45 = vld [vmem:[#allocation2] sm:$0xff]  ;;  %v367_v50 = vld [vmem:[#allocation2 + $0x18] sm:$0xff] }
  0xbd   :  { %1651 = vmatprep.subr.bf16.mxu0 %v1650_v49  ;;  %v298_v53 = vpop.permute.xlu1 %297 }
  0xbe   :  { %1653 = vmatpush3.bf16.msra.mxu0 %v1650_v49  ;;  %v293_v54 = vpop.permute.xlu0 %292  ;;  %v315_v57 = vmul.f32 %v298_v53, %v219_v51 }
  0xbf   :  { %v314_v58 = vmul.f32 %v293_v54, %v218_v52  ;;  %v366_v52 = vld [vmem:[#allocation2 + $0x10] sm:$0xff] }
  0xc0   :  { %v331_v59 = vadd.f32 %v315_v57, %v187_v55 }
  0xc1   :  { %v330_v60 = vadd.f32 %v314_v58, %v186_v56  ;;  %v2130_v35 = vpop.permute.xlu1 %642  ;;  %v369_v58 = vld [vmem:[#allocation2 + $0x28] sm:$0xff] }
  0xc2   :  { %v2110_v25 = vpop.permute.xlu0 %637 }
  0xc3   :  { %v1654_v61 = vpack.c.bf16 %v331_v59, %v330_v60  ;;  %v368_v59 = vld [vmem:[#allocation2 + $0x20] sm:$0xff] }
  0xc5   :  { %1655 = vmatprep.subr.bf16.mxu0 %v1654_v61  ;;  %v2134_v38 = vpop.permute.xlu1 %652 }
  0xc6   :  { %1657 = vmatpush3.bf16.msra.mxu0 %v1654_v61  ;;  %v2112_v26 = vpop.permute.xlu0 %647  ;;  %v609_v61 = vld [vmem:[%s2466_s7] sm:$0xff] }
  0xc7   :  { %1659 = vmatprep.subr.bf16.mxu0 %v1658_v21 }
  0xc9   :  { %1547 = vmatmul.mubr.f32.vlgmr.msra.gmra.mrb[0].mxu0 %v1410_v63  ;;  %v2138_v40 = vpop.permute.xlu1 %662 }
  0xca   :  { %1549 = vmatprep.mubr.f32.mxu0 %v1413_v0  ;;  %1661 = vmatpush3.bf16.msra.mxu0 %v1658_v21  ;;  %v2114_v27 = vpop.permute.xlu0 %657 }
  0xcb   :  { %1663 = vmatprep.subr.bf16.mxu0 %v1662_v24 }
  0xcd   :  { %1550 = vmatmul.mubr.f32.gmra.mrb[2].mxu0 %v1414_v2  ;;  %v2142_v42 = vpop.permute.xlu1 %672 }
  0xce   :  { %1552 = vmatprep.mubr.f32.mxu0 %v1417_v3  ;;  %1665 = vmatpush3.bf16.msra.mxu0 %v1662_v24  ;;  %v2116_v28 = vpop.permute.xlu0 %667 }
  0xd1   :  { %1553 = vmatmul.mubr.f32.gmra.mrb[4].mxu0 %v1418_v5  ;;  %v2146_v51 = vpop.permute.xlu1 %682 }
  0xd2   :  { %1555 = vmatprep.mubr.f32.mxu0 %v1421_v6  ;;  %v2118_v29 = vpop.permute.xlu0 %677  ;;  %v370_v6 = vld [vmem:[#allocation2 + $0x30] sm:$0xff] }
  0xd5   :  { %1556 = vmatmul.mubr.f32.gmra.mrb[6].mxu0 %v1422_v7  ;;  %v2155_v0 = vpop.permute.xlu1 %692 }
  0xd6   :  { %1558 = vmatprep.mubr.f32.mxu0 %v1425_v8  ;;  %v2120_v30 = vpop.permute.xlu0 %687 }
  0xd9   :  { %1559 = vmatmul.mubr.f32.gmra.mrb[8].mxu0 %v1426_v10 }
  0xda   :  { %1561 = vmatprep.mubr.f32.mxu0 %v1429_v11  ;;  %v2122_v31 = vpop.permute.xlu0 %697  ;;  %v611_v11 = vld [vmem:[%s2466_s7 + $0x10] sm:$0xff] }
  0xdb   :  { %v707_v24 = vmul.f32 %v2110_v25, %v611_v11 }
  0xdd   :  { %1562 = vmatmul.mubr.f32.gmra.mrb[10].mxu0 %v1430_v13 }
  0xde   :  { %1564 = vmatprep.mubr.f32.mxu0 %v1433_v14  ;;  %v2124_v32 = vpop.permute.xlu0 %739 }
  0xe1   :  { %1565 = vmatmul.mubr.f32.gmra.mrb[12].mxu0 %v1434_v16 }
  0xe2   :  { %1567 = vmatprep.mubr.f32.mxu0 %v1437_v17  ;;  %v2126_v33 = vpop.permute.xlu0 %749  ;;  %v373_v17 = vld [vmem:[#allocation2 + $0x48] sm:$0xff] }
  0xe5   :  { %1568 = vmatmul.mubr.f32.gmra.mrb[14].mxu0 %v1438_v18 }
  0xe6   :  { %v2128_v34 = vpop.permute.xlu0 %759 }
  0xea   :  { %v2132_v36 = vpop.permute.xlu0 %769 }
  0xee   :  { %v2136_v39 = vpop.permute.xlu0 %779 }
  0xf2   :  { %v2140_v41 = vpop.permute.xlu0 %789 }
  0xf6   :  { %v2144_v43 = vpop.permute.xlu0 %799 }
  0xfa   :  { %v628_v53 = vpop.permute.xlu0 %627 }
  0xfb   :  { %v705_v8 = vmul.f32 %v628_v53, %v609_v61 }
  0xfe   :  { %v633_v2 = vpop.permute.xlu0 %632 }
  0xff   :  { %v706_v12 = vmul.f32 %v633_v2, %v610_v1 }
 0x19c   :  { %v1548_v46 = vpop.f32.mrb[0].mxu0 }
 0x19d   :  { %v526_v47 = vadd.f32 %v1548_v46, %v365_v44  ;;  %v446_v48 = vpop.f32.mrb[1].mxu0  ;;  %v2182_v44 = vpop.permute.xlu1 %702 }
 0x19e   :  { %v525_v49 = vadd.f32 %v446_v48, %v364_v45  ;;  %v613_v48 = vld [vmem:[%s2466_s7 + $0x20] sm:$0xff] }
 0x19f   :  { %543 = vst.msk [vmem:[#allocation2 + $0x8] sm:$0xff] %vm43_vm0, %v526_v47  ;;  %v708_v47 = vmul.f32 %v2130_v35, %v612_v15 }
 0x1a0   :  { %542 = vst.msk [vmem:[#allocation2] sm:$0xff] %vm43_vm0, %v525_v49  ;;  %v1551_v54 = vpop.f32.mrb[2].mxu0 }
 0x1a1   :  { %v528_v55 = vadd.f32 %v1551_v54, %v367_v50  ;;  %v456_v56 = vpop.f32.mrb[3].mxu0  ;;  %v375_v54 = vld [vmem:[#allocation2 + $0x58] sm:$0xff] }
 0x1a2   :  { %v527_v57 = vadd.f32 %v456_v56, %v366_v52  ;;  %v614_v52 = vld [vmem:[%s2466_s7 + $0x28] sm:$0xff] }
 0x1a3   :  { %545 = vst.msk [vmem:[#allocation2 + $0x18] sm:$0xff] %vm43_vm0, %v528_v55 }
 0x1a4   :  { %544 = vst.msk [vmem:[#allocation2 + $0x10] sm:$0xff] %vm43_vm0, %v527_v57  ;;  %v1554_v60 = vpop.f32.mrb[4].mxu0 }
 0x1a5   :  { %v530_v62 = vadd.f32 %v1554_v60, %v369_v58  ;;  %v466_v63 = vpop.f32.mrb[5].mxu0 }
 0x1a6   :  { %v529_v3 = vadd.f32 %v466_v63, %v368_v59  ;;  %v2160_v5 = vld [vmem:[#allocation2 + $0x8] sm:$0xff]  ;;  %v709_v59 = vmul.f32 %v2112_v26, %v613_v48  ;;  %v615_v63 = vld [vmem:[%s2466_s7 + $0x30] sm:$0xff] }
 0x1a7   :  { %547 = vst.msk [vmem:[#allocation2 + $0x28] sm:$0xff] %vm43_vm0, %v530_v62  ;;  %v2163_v37 = vld [vmem:[#allocation2] sm:$0xff]  ;;  %v834_v7 = vmul.f32 %v633_v2, %v2160_v5  ;;  %v710_v62 = vmul.f32 %v2134_v38, %v614_v52 }
 0x1a8   :  { %546 = vst.msk [vmem:[#allocation2 + $0x20] sm:$0xff] %vm43_vm0, %v529_v3  ;;  %v1557_v9 = vpop.f32.mrb[6].mxu0  ;;  %v833_v10 = vmul.f32 %v628_v53, %v2163_v37  ;;  %v616_v3 = vld [vmem:[%s2466_s7 + $0x38] sm:$0xff] }
 0x1a9   :  { %v532_v13 = vadd.f32 %v1557_v9, %v371_v4  ;;  %v476_v14 = vpop.f32.mrb[7].mxu0  ;;  %v850_v21 = vadd.f32 %v834_v7, %v706_v12  ;;  %v2216_v4 = vpop.permute.xlu1 %744  ;;  %v377_v7 = vld [vmem:[#allocation2 + $0x68] sm:$0xff]  ;;  %v711_v12 = vmul.f32 %v2114_v27, %v615_v63  ;;  %v712_v15 = vmul.f32 %v2138_v40, %v616_v3 }
 0x1aa   :  { %v531_v16 = vadd.f32 %v476_v14, %v370_v6  ;;  %v849_v18 = vadd.f32 %v833_v10, %v705_v8  ;;  %v2174_v19 = vld [vmem:[#allocation2 + $0x18] sm:$0xff]  ;;  %v622_v3 = vld [vmem:[%s2466_s7 + $0x68] sm:$0xff] }
 0x1ab   :  { %549 = vst.msk [vmem:[#allocation2 + $0x38] sm:$0xff] %vm43_vm0, %v532_v13  ;;  %v2177_v22 = vld [vmem:[#allocation2 + $0x10] sm:$0xff]  ;;  %v836_v23 = vmul.f32 %v2130_v35, %v2174_v19 }
 0x1ac   :  { %548 = vst.msk [vmem:[#allocation2 + $0x30] sm:$0xff] %vm43_vm0, %v531_v16  ;;  %v1560_v45 = vpop.f32.mrb[8].mxu0  ;;  %1578 = vmatprep.mubr.msk.f32.mxu0 %vm43_vm0, %v849_v18  ;;  %v835_v46 = vmul.f32 %v2110_v25, %v2177_v22  ;;  %v374_v25 = vld [vmem:[#allocation2 + $0x50] sm:$0xff]  ;;  %v617_v16 = vld [vmem:[%s2466_s7 + $0x40] sm:$0xff] }
 0x1ad   :  { %v534_v49 = vadd.f32 %v1560_v45, %v373_v17  ;;  %v486_v50 = vpop.f32.mrb[9].mxu0  ;;  %1579 = vmatmul.mubr.msk.f32.vlgmr.msra.gmra.mrb[16].mxu0 %vm43_vm0, %v850_v21  ;;  %v852_v35 = vadd.f32 %v836_v23, %v708_v47  ;;  %v379_v23 = vld [vmem:[#allocation2 + $0x78] sm:$0xff]  ;;  %v713_v48 = vmul.f32 %v2116_v28, %v617_v16 }
 0x1ae   :  { %v533_v53 = vadd.f32 %v486_v50, %v372_v20  ;;  %v851_v55 = vadd.f32 %v835_v46, %v707_v24  ;;  %v2196_v56 = vld [vmem:[#allocation2 + $0x28] sm:$0xff] }
 0x1af   :  { %551 = vst.msk [vmem:[#allocation2 + $0x48] sm:$0xff] %vm43_vm0, %v534_v49  ;;  %v2199_v57 = vld [vmem:[#allocation2 + $0x20] sm:$0xff]  ;;  %v838_v58 = vmul.f32 %v2134_v38, %v2196_v56  ;;  %v618_v20 = vld [vmem:[%s2466_s7 + $0x48] sm:$0xff]  ;;  %v2246_v49 = vpop.permute.xlu1 %754 }
 0x1b0   :  { %550 = vst.msk [vmem:[#allocation2 + $0x40] sm:$0xff] %vm43_vm0, %v533_v53  ;;  %v1563_v60 = vpop.f32.mrb[10].mxu0  ;;  %1581 = vmatprep.mubr.msk.f32.mxu1 %vm43_vm0, %v851_v55  ;;  %v837_v61 = vmul.f32 %v2112_v26, %v2199_v57  ;;  %v376_v38 = vld [vmem:[#allocation2 + $0x60] sm:$0xff]  ;;  %v714_v53 = vmul.f32 %v2142_v42, %v618_v20 }
 0x1b1   :  { %v536_v1 = vadd.f32 %v1563_v60, %v375_v54  ;;  %v496_v2 = vpop.f32.mrb[11].mxu0  ;;  %1582 = vmatmul.mubr.msk.f32.vlgmr.msra.gmra.mrb[0].mxu1 %vm43_vm0, %v852_v35  ;;  %v854_v9 = vadd.f32 %v838_v58, %v710_v62  ;;  %v619_v54 = vld [vmem:[%s2466_s7 + $0x50] sm:$0xff]  ;;  %v620_v35 = vld [vmem:[%s2466_s7 + $0x58] sm:$0xff] }
 0x1b2   :  { %v535_v6 = vadd.f32 %v496_v2, %v374_v25  ;;  %v853_v8 = vadd.f32 %v837_v61, %v709_v59  ;;  %v2218_v26 = vld [vmem:[#allocation2 + $0x38] sm:$0xff]  ;;  %v715_v62 = vmul.f32 %v2118_v29, %v619_v54  ;;  %v621_v2 = vld [vmem:[%s2466_s7 + $0x60] sm:$0xff] }
 0x1b3   :  { %553 = vst.msk [vmem:[#allocation2 + $0x58] sm:$0xff] %vm43_vm0, %v536_v1  ;;  %v2221_v10 = vld [vmem:[#allocation2 + $0x30] sm:$0xff]  ;;  %v840_v11 = vmul.f32 %v2138_v40, %v2218_v26  ;;  %v716_v1 = vmul.f32 %v2146_v51, %v620_v35  ;;  %v869_v35 = vmul.f32 %v2128_v34, %v2199_v57 }
 0x1b4   :  { %552 = vst.msk [vmem:[#allocation2 + $0x50] sm:$0xff] %vm43_vm0, %v535_v6  ;;  %v1566_v13 = vpop.f32.mrb[12].mxu0  ;;  %1584 = vmatprep.mubr.msk.f32.mxu1 %vm43_vm0, %v853_v8  ;;  %v839_v14 = vmul.f32 %v2114_v27, %v2221_v10  ;;  %v378_v27 = vld [vmem:[#allocation2 + $0x70] sm:$0xff]  ;;  %v765_v6 = vpop.permute.xlu1 %764 }
 0x1b5   :  { %v538_v17 = vadd.f32 %v1566_v13, %v377_v7  ;;  %v506_v18 = vpop.f32.mrb[13].mxu0  ;;  %1585 = vmatmul.mubr.msk.f32.gmra.mrb[2].mxu1 %vm43_vm0, %v854_v9  ;;  %v856_v40 = vadd.f32 %v840_v11, %v712_v15  ;;  %v623_v13 = vld [vmem:[%s2466_s7 + $0x70] sm:$0xff] }
 0x1b6   :  { %v537_v21 = vadd.f32 %v506_v18, %v376_v38  ;;  %v855_v24 = vadd.f32 %v839_v14, %v711_v12  ;;  %v2238_v45 = vld [vmem:[#allocation2 + $0x48] sm:$0xff]  ;;  %v718_v12 = vmul.f32 %v2155_v0, %v622_v3  ;;  %v624_v14 = vld [vmem:[%s2466_s7 + $0x78] sm:$0xff]  ;;  %v719_v20 = vmul.f32 %v2122_v31, %v623_v13 }
 0x1b7   :  { %555 = vst.msk [vmem:[#allocation2 + $0x68] sm:$0xff] %vm43_vm0, %v538_v17  ;;  %v2241_v46 = vld [vmem:[#allocation2 + $0x40] sm:$0xff]  ;;  %v842_v47 = vmul.f32 %v2142_v42, %v2238_v45 }
 0x1b8   :  { %554 = vst.msk [vmem:[#allocation2 + $0x60] sm:$0xff] %vm43_vm0, %v537_v21  ;;  %v1569_v50 = vpop.f32.mrb[14].mxu0  ;;  %1587 = vmatprep.mubr.msk.f32.mxu1 %vm43_vm0, %v855_v24  ;;  %v841_v52 = vmul.f32 %v2116_v28, %v2241_v46  ;;  %v721_v17 = vld [vmem:[%s2467_s8] sm:$0xff]  ;;  %v775_v21 = vpop.permute.xlu1 %774  ;;  %v865_v24 = vmul.f32 %v2124_v32, %v2163_v37  ;;  %v867_v37 = vmul.f32 %v2126_v33, %v2177_v22 }
 0x1b9   :  { %v540_v55 = vadd.f32 %v1569_v50, %v379_v23  ;;  %v516_v25 = vpop.f32.mrb[15].mxu0  ;;  %1588 = vmatmul.mubr.msk.f32.gmra.mrb[4].mxu1 %vm43_vm0, %v856_v40  ;;  %v858_v28 = vadd.f32 %v842_v47, %v714_v53  ;;  %v722_v40 = vld [vmem:[%s2467_s8 + $0x8] sm:$0xff]  ;;  %v817_v47 = vmul.f32 %v2124_v32, %v721_v17  ;;  %v723_v50 = vld [vmem:[%s2467_s8 + $0x10] sm:$0xff]  ;;  %v724_v32 = vld [vmem:[%s2467_s8 + $0x18] sm:$0xff]  ;;  %v872_v3 = vmul.f32 %v775_v21, %v2218_v26 }
 0x1ba   :  { %v539_v58 = vadd.f32 %v516_v25, %v378_v27  ;;  %v857_v59 = vadd.f32 %v841_v52, %v713_v48  ;;  %v2260_v60 = vld [vmem:[#allocation2 + $0x58] sm:$0xff]  ;;  %v720_v27 = vmul.f32 %v2182_v44, %v624_v14  ;;  %v818_v53 = vmul.f32 %v2216_v4, %v722_v40  ;;  %v731_v26 = vld [vmem:[%s2467_s8 + $0x50] sm:$0xff] }
 0x1bb   :  { %557 = vst.msk [vmem:[#allocation2 + $0x78] sm:$0xff] %vm43_vm0, %v540_v55  ;;  %v2263_v42 = vld [vmem:[#allocation2 + $0x50] sm:$0xff]  ;;  %v844_v61 = vmul.f32 %v2146_v51, %v2260_v60  ;;  %v717_v51 = vmul.f32 %v2120_v30, %v621_v2  ;;  %v819_v54 = vmul.f32 %v2126_v33, %v723_v50  ;;  %v868_v25 = vmul.f32 %v2246_v49, %v2174_v19  ;;  %v726_v33 = vld [vmem:[%s2467_s8 + $0x28] sm:$0xff] }
 0x1bc   :  { %556 = vst.msk [vmem:[#allocation2 + $0x70] sm:$0xff] %vm43_vm0, %v539_v58  ;;  %1590 = vmatprep.mubr.msk.f32.mxu1 %vm43_vm0, %v857_v59  ;;  %v843_v63 = vmul.f32 %v2118_v29, %v2263_v42  ;;  %v785_v55 = vpop.permute.xlu1 %784  ;;  %v820_v58 = vmul.f32 %v2246_v49, %v724_v32  ;;  %v727_v19 = vld [vmem:[%s2467_s8 + $0x30] sm:$0xff]  ;;  %v871_v49 = vmul.f32 %v2132_v36, %v2221_v10 }
 0x1bd   :  { %1591 = vmatmul.mubr.msk.f32.gmra.mrb[6].mxu1 %vm43_vm0, %v858_v28  ;;  %v860_v38 = vadd.f32 %v844_v61, %v716_v1  ;;  %v870_v61 = vmul.f32 %v765_v6, %v2196_v56  ;;  %v823_v1 = vmul.f32 %v2132_v36, %v727_v19  ;;  %v729_v56 = vld [vmem:[%s2467_s8 + $0x40] sm:$0xff]  ;;  %v873_v10 = vmul.f32 %v2136_v39, %v2241_v46  ;;  %v730_v36 = vld [vmem:[%s2467_s8 + $0x48] sm:$0xff] }
 0x1be   :  { %v859_v7 = vadd.f32 %v843_v63, %v715_v62  ;;  %v2280_v8 = vld [vmem:[#allocation2 + $0x68] sm:$0xff]  ;;  %v884_v28 = vadd.f32 %v868_v25, %v820_v58  ;;  %v822_v63 = vmul.f32 %v765_v6, %v726_v33  ;;  %v826_v13 = vmul.f32 %v785_v55, %v730_v36 }
 0x1bf   :  { %v2282_v9 = vld [vmem:[#allocation2 + $0x60] sm:$0xff]  ;;  %v846_v29 = vmul.f32 %v2155_v0, %v2280_v8  ;;  %v827_v14 = vmul.f32 %v2140_v41, %v731_v26 }
 0x1c0   :  { %1593 = vmatprep.mubr.msk.f32.mxu1 %vm43_vm0, %v859_v7  ;;  %v845_v11 = vmul.f32 %v2120_v30, %v2282_v9  ;;  %v795_v57 = vpop.permute.xlu1 %794  ;;  %v886_v2 = vadd.f32 %v870_v61, %v822_v63  ;;  %v887_v7 = vadd.f32 %v871_v49, %v823_v1 }
 0x1c1   :  { %1594 = vmatmul.mubr.msk.f32.gmra.mrb[8].mxu1 %vm43_vm0, %v860_v38  ;;  %v862_v30 = vadd.f32 %v846_v29, %v718_v12  ;;  %v825_v38 = vmul.f32 %v2136_v39, %v729_v56  ;;  %v875_v12 = vmul.f32 %v2140_v41, %v2263_v42  ;;  %v732_v39 = vld [vmem:[%s2467_s8 + $0x58] sm:$0xff]  ;;  %v876_v17 = vmul.f32 %v795_v57, %v2260_v60  ;;  %v734_v41 = vld [vmem:[%s2467_s8 + $0x68] sm:$0xff]  ;;  %v735_v60 = vld [vmem:[%s2467_s8 + $0x70] sm:$0xff] }
 0x1c2   :  { %v861_v15 = vadd.f32 %v845_v11, %v717_v51  ;;  %v2298_v16 = vld [vmem:[#allocation2 + $0x78] sm:$0xff]  ;;  %v874_v11 = vmul.f32 %v785_v55, %v2238_v45 }
 0x1c3   :  { %v2303_v18 = vld [vmem:[#allocation2 + $0x70] sm:$0xff]  ;;  %v848_v0 = vmul.f32 %v2182_v44, %v2298_v16  ;;  %v881_v44 = vadd.f32 %v865_v24, %v817_v47  ;;  %v889_v46 = vadd.f32 %v873_v10, %v825_v38  ;;  %v891_v42 = vadd.f32 %v875_v12, %v827_v14 }
 0x1c4   :  { %1596 = vmatprep.mubr.msk.f32.mxu1 %vm43_vm0, %v861_v15  ;;  %v847_v23 = vmul.f32 %v2122_v31, %v2303_v18  ;;  %v866_v31 = vmul.f32 %v2216_v4, %v2160_v5  ;;  %v725_v5 = vld [vmem:[%s2467_s8 + $0x20] sm:$0xff]  ;;  %v883_v4 = vadd.f32 %v867_v37, %v819_v54  ;;  %v805_v29 = vpop.permute.xlu1 %804  ;;  %v890_v45 = vadd.f32 %v874_v11, %v826_v13 }
 0x1c5   :  { %1597 = vmatmul.mubr.msk.f32.gmra.mrb[10].mxu1 %vm43_vm0, %v862_v30  ;;  %v864_v52 = vadd.f32 %v848_v0, %v720_v27  ;;  %v821_v59 = vmul.f32 %v2128_v34, %v725_v5  ;;  %v728_v34 = vld [vmem:[%s2467_s8 + $0x38] sm:$0xff]  ;;  %v733_v15 = vld [vmem:[%s2467_s8 + $0x60] sm:$0xff]  ;;  %v877_v0 = vmul.f32 %v2144_v43, %v2282_v9  ;;  %v878_v24 = vmul.f32 %v805_v29, %v2280_v8 }
 0x1c6   :  { %v863_v48 = vadd.f32 %v847_v23, %v719_v20  ;;  %v882_v22 = vadd.f32 %v866_v31, %v818_v53  ;;  %v824_v6 = vmul.f32 %v775_v21, %v728_v34  ;;  %v828_v20 = vmul.f32 %v795_v57, %v732_v39 }
 0x1c7   :  { %v885_v62 = vadd.f32 %v869_v35, %v821_v59  ;;  %v829_v21 = vmul.f32 %v2144_v43, %v733_v15  ;;  %v830_v40 = vmul.f32 %v805_v29, %v734_v41  ;;  %v736_v43 = vld [vmem:[%s2467_s8 + $0x78] sm:$0xff]  ;;  %s1703_s8 = smov [#allocation3]  }
 0x1c8   :  { %1599 = vmatprep.mubr.msk.f32.mxu1 %vm43_vm0, %v863_v48  ;;  %v888_v51 = vadd.f32 %v872_v3, %v824_v6  ;;  %v810_v30 = vpop.permute.xlu1 %809  ;;  %v892_v23 = vadd.f32 %v876_v17, %v828_v20 }
 0x1c9   :  { %1600 = vmatmul.mubr.msk.f32.gmra.mrb[12].mxu1 %vm43_vm0, %v864_v52  ;;  %v893_v27 = vadd.f32 %v877_v0, %v829_v21  ;;  %v879_v9 = vmul.f32 %v810_v30, %v2303_v18  ;;  %v831_v47 = vmul.f32 %v810_v30, %v735_v60  ;;  %v894_v50 = vadd.f32 %v878_v24, %v830_v40  ;;  %v2413_v18 = vld [vmem:[%s2469_s10] ss:$0 sm:$0xff]  ;;  %s1363_s10 = sshll.u32 %s1703_s8, 4  ;;  %s1364_s10 = int_to_ptr.vmem [resolvable:$true] %s1363_s10 }
 0x1ca   :  { %1602 = vmatprep.mubr.msk.f32.mxu1 %vm43_vm0, %v881_v44  ;;  %s1677_s25 = scalar_lea.vmem %s1364_s10, 4096  ;;  %p1682_p1 = scmp.lt.s32.totalorder %s1364_s10, %s1364_s10 }
 0x1cb   :  { %v895_v31 = vadd.f32 %v879_v9, %v831_v47  ;;  %p1678_p0 = scmp.ne.s32.totalorder %s1364_s10, %s1677_s25  ;;  %p1683_p2 = scmp.lt.s32.totalorder %s1677_s25, %s1677_s25 }
 0x1cc   :  { %v815_v48 = vpop.permute.xlu1 %814 }
 0x1cd   :  { %1603 = vmatmul.mubr.msk.f32.gmra.mrb[14].mxu1 %vm43_vm0, %v882_v22  ;;  %v880_v52 = vmul.f32 %v815_v48, %v2298_v16  ;;  %v832_v37 = vmul.f32 %v815_v48, %v736_v43  ;;  %p1684_p3 = por %p1683_p2, %p1682_p1 }
 0x1ce   :  { %1605 = vmatprep.mubr.msk.f32.mxu1 %vm43_vm0, %v883_v4 }
 0x1cf   :  { %v896_v8 = vadd.f32 %v880_v52, %v832_v37  ;;  %p1685_p4 = pnand %p1684_p3, %p1678_p0 }
 0x1d1   :  { %1606 = vmatmul.mubr.msk.f32.gmra.mrb[16].mxu1 %vm43_vm0, %v884_v28 }
 0x1d2   :  { %1608 = vmatprep.mubr.msk.f32.mxu1 %vm43_vm0, %v885_v62 }
 0x1d5   :  { %1609 = vmatmul.mubr.msk.f32.gmra.mrb[18].mxu1 %vm43_vm0, %v886_v2 }
 0x1d6   :  { %1611 = vmatprep.mubr.msk.f32.mxu1 %vm43_vm0, %v887_v7 }
 0x1d9   :  { %1612 = vmatmul.mubr.msk.f32.gmra.mrb[20].mxu1 %vm43_vm0, %v888_v51 }
 0x1da   :  { %1614 = vmatprep.mubr.msk.f32.mxu1 %vm43_vm0, %v889_v46 }
 0x1dd   :  { %1615 = vmatmul.mubr.msk.f32.gmra.mrb[22].mxu1 %vm43_vm0, %v890_v45 }
 0x1de   :  { %1617 = vmatprep.mubr.msk.f32.mxu1 %vm43_vm0, %v891_v42 }
 0x1e1   :  { %1618 = vmatmul.mubr.msk.f32.gmra.mrb[24].mxu1 %vm43_vm0, %v892_v23 }
 0x1e2   :  { %1620 = vmatprep.mubr.msk.f32.mxu1 %vm43_vm0, %v893_v27 }
 0x1e5   :  { %1621 = vmatmul.mubr.msk.f32.gmra.mrb[26].mxu1 %vm43_vm0, %v894_v50 }
 0x1e6   :  { %1623 = vmatprep.mubr.msk.f32.mxu1 %vm43_vm0, %v895_v31 }
 0x1e9   :  { %1624 = vmatmul.mubr.msk.f32.gmra.mrb[28].mxu1 %vm43_vm0, %v896_v8 }
 0x280   :  { %v1580_v44 = vpop.f32.mrb[16].mxu0 }
 0x281   :  { %v1076_v53 = vadd.f32 %v1580_v44, %v2413_v18  ;;  %v1070_v32 = vpop.f32.mrb[17].mxu0 }
 0x282   :  { %v1071_v16 = vadd.f32 %v2413_v18, %v1070_v32 }
 0x283   :  { %vm1230_vm1 = vcmp.gt.f32.partialorder %v1076_v53, 0.0  ;;  %v1262_v54 = vmul.f32 0.01, %v1076_v53 }
 0x284   :  { %vm1229_vm2 = vcmp.gt.f32.partialorder %v1071_v16, 0.0  ;;  %v1261_v55 = vmul.f32 0.01, %v1071_v16  ;;  %v1583_v5 = vpop.f32.mrb[0].mxu1 }
 0x285   :  { %v1294_v22 = vsel %vm1230_vm1, %v1076_v53, %v1262_v54  ;;  %v1086_v25 = vadd.f32 %v1583_v5, %v2413_v18  ;;  %v1080_v4 = vpop.f32.mrb[1].mxu1 }
 0x286   :  { %1326 = vst [vmem:[#allocation3 + $0x8] sm:$0xff] %v1294_v22  ;;  %v1293_v35 = vsel %vm1229_vm2, %v1071_v16, %v1261_v55  ;;  %v1081_v58 = vadd.f32 %v2413_v18, %v1080_v4 }
 0x287   :  { %1325 = vst [vmem:[#allocation3] sm:$0xff] %v1293_v35  ;;  %vm1232_vm3 = vcmp.gt.f32.partialorder %v1086_v25, 0.0  ;;  %v1264_v33 = vmul.f32 0.01, %v1086_v25 }
 0x288   :  { %vm1231_vm4 = vcmp.gt.f32.partialorder %v1081_v58, 0.0  ;;  %v1263_v59 = vmul.f32 0.01, %v1081_v58  ;;  %v1586_v19 = vpop.f32.mrb[2].mxu1 }
 0x289   :  { %v1296_v28 = vsel %vm1232_vm3, %v1086_v25, %v1264_v33  ;;  %v1096_v61 = vadd.f32 %v1586_v19, %v2413_v18  ;;  %v1090_v57 = vpop.f32.mrb[3].mxu1 }
 0x28a   :  { %1328 = vst [vmem:[#allocation3 + $0x18] sm:$0xff] %v1296_v28  ;;  %v1295_v62 = vsel %vm1231_vm4, %v1081_v58, %v1263_v59  ;;  %v1091_v49 = vadd.f32 %v2413_v18, %v1090_v57 }
 0x28b   :  { %1327 = vst [vmem:[#allocation3 + $0x10] sm:$0xff] %v1295_v62  ;;  %vm1234_vm5 = vcmp.gt.f32.partialorder %v1096_v61, 0.0  ;;  %v1266_v63 = vmul.f32 0.01, %v1096_v61 }
 0x28c   :  { %vm1233_vm6 = vcmp.gt.f32.partialorder %v1091_v49, 0.0  ;;  %v1265_v34 = vmul.f32 0.01, %v1091_v49  ;;  %v1589_v1 = vpop.f32.mrb[4].mxu1 }
 0x28d   :  { %v1298_v56 = vsel %vm1234_vm5, %v1096_v61, %v1266_v63  ;;  %v1106_v2 = vadd.f32 %v1589_v1, %v2413_v18  ;;  %v1100_v3 = vpop.f32.mrb[5].mxu1 }
 0x28e   :  { %1330 = vst [vmem:[#allocation3 + $0x28] sm:$0xff] %v1298_v56  ;;  %v1297_v7 = vsel %vm1233_vm6, %v1091_v49, %v1265_v34  ;;  %v1101_v10 = vadd.f32 %v2413_v18, %v1100_v3 }
 0x28f   :  { %1329 = vst [vmem:[#allocation3 + $0x20] sm:$0xff] %v1297_v7  ;;  %vm1236_vm7 = vcmp.gt.f32.partialorder %v1106_v2, 0.0  ;;  %v1268_v6 = vmul.f32 0.01, %v1106_v2 }
 0x290   :  { %vm1235_vm8 = vcmp.gt.f32.partialorder %v1101_v10, 0.0  ;;  %v1267_v36 = vmul.f32 0.01, %v1101_v10  ;;  %v1592_v38 = vpop.f32.mrb[6].mxu1 }
 0x291   :  { %v1300_v29 = vsel %vm1236_vm7, %v1106_v2, %v1268_v6  ;;  %v1116_v26 = vadd.f32 %v1592_v38, %v2413_v18  ;;  %v1110_v51 = vpop.f32.mrb[7].mxu1 }
 0x292   :  { %1332 = vst [vmem:[#allocation3 + $0x38] sm:$0xff] %v1300_v29  ;;  %v1299_v11 = vsel %vm1235_vm8, %v1101_v10, %v1267_v36  ;;  %v1111_v46 = vadd.f32 %v2413_v18, %v1110_v51 }
 0x293   :  { %1331 = vst [vmem:[#allocation3 + $0x30] sm:$0xff] %v1299_v11  ;;  %vm1238_vm9 = vcmp.gt.f32.partialorder %v1116_v26, 0.0  ;;  %v1270_v12 = vmul.f32 0.01, %v1116_v26 }
 0x294   :  { %vm1237_vm10 = vcmp.gt.f32.partialorder %v1111_v46, 0.0  ;;  %v1269_v13 = vmul.f32 0.01, %v1111_v46  ;;  %v1595_v39 = vpop.f32.mrb[8].mxu1 }
 0x295   :  { %v1302_v14 = vsel %vm1238_vm9, %v1116_v26, %v1270_v12  ;;  %v1126_v15 = vadd.f32 %v1595_v39, %v2413_v18  ;;  %v1120_v45 = vpop.f32.mrb[9].mxu1 }
 0x296   :  { %1334 = vst [vmem:[#allocation3 + $0x48] sm:$0xff] %v1302_v14  ;;  %v1301_v17 = vsel %vm1237_vm10, %v1111_v46, %v1269_v13  ;;  %v1121_v30 = vadd.f32 %v2413_v18, %v1120_v45 }
 0x297   :  { %1333 = vst [vmem:[#allocation3 + $0x40] sm:$0xff] %v1301_v17  ;;  %vm1240_vm11 = vcmp.gt.f32.partialorder %v1126_v15, 0.0  ;;  %v1272_v42 = vmul.f32 0.01, %v1126_v15 }
 0x298   :  { %vm1239_vm12 = vcmp.gt.f32.partialorder %v1121_v30, 0.0  ;;  %v1271_v0 = vmul.f32 0.01, %v1121_v30  ;;  %v1598_v20 = vpop.f32.mrb[10].mxu1 }
 0x299   :  { %v1304_v41 = vsel %vm1240_vm11, %v1126_v15, %v1272_v42  ;;  %v1136_v21 = vadd.f32 %v1598_v20, %v2413_v18  ;;  %v1130_v60 = vpop.f32.mrb[11].mxu1 }
 0x29a   :  { %1336 = vst [vmem:[#allocation3 + $0x58] sm:$0xff] %v1304_v41  ;;  %v1303_v23 = vsel %vm1239_vm12, %v1121_v30, %v1271_v0  ;;  %v1131_v24 = vadd.f32 %v2413_v18, %v1130_v60 }
 0x29b   :  { %1335 = vst [vmem:[#allocation3 + $0x50] sm:$0xff] %v1303_v23  ;;  %vm1242_vm13 = vcmp.gt.f32.partialorder %v1136_v21, 0.0  ;;  %v1274_v27 = vmul.f32 0.01, %v1136_v21 }
 0x29c   :  { %vm1241_vm14 = vcmp.gt.f32.partialorder %v1131_v24, 0.0  ;;  %v1273_v9 = vmul.f32 0.01, %v1131_v24  ;;  %v1601_v40 = vpop.f32.mrb[12].mxu1 }
 0x29d   :  { %v1306_v47 = vsel %vm1242_vm13, %v1136_v21, %v1274_v27  ;;  %v1146_v43 = vadd.f32 %v1601_v40, %v2413_v18  ;;  %v1140_v48 = vpop.f32.mrb[13].mxu1 }
 0x29e   :  { %1338 = vst [vmem:[#allocation3 + $0x68] sm:$0xff] %v1306_v47  ;;  %v1305_v50 = vsel %vm1241_vm14, %v1131_v24, %v1273_v9  ;;  %v1141_v52 = vadd.f32 %v2413_v18, %v1140_v48 }
 0x29f   :  { %1337 = vst [vmem:[#allocation3 + $0x60] sm:$0xff] %v1305_v50  ;;  %vm1244_vm15 = vcmp.gt.f32.partialorder %v1146_v43, 0.0  ;;  %v1276_v31 = vmul.f32 0.01, %v1146_v43 }
 0x2a0   :  { %vm1243_vm0 = vcmp.gt.f32.partialorder %v1141_v52, 0.0  ;;  %v1275_v37 = vmul.f32 0.01, %v1141_v52  ;;  %v1604_v8 = vpop.f32.mrb[14].mxu1 }
 0x2a1   :  { %v1308_v44 = vsel %vm1244_vm15, %v1146_v43, %v1276_v31  ;;  %v1156_v53 = vadd.f32 %v1604_v8, %v2413_v18  ;;  %v1150_v32 = vpop.f32.mrb[15].mxu1 }
 0x2a2   :  { %1340 = vst [vmem:[#allocation3 + $0x78] sm:$0xff] %v1308_v44  ;;  %v1307_v16 = vsel %vm1243_vm0, %v1141_v52, %v1275_v37  ;;  %v1151_v54 = vadd.f32 %v2413_v18, %v1150_v32 }
 0x2a3   :  { %1339 = vst [vmem:[#allocation3 + $0x70] sm:$0xff] %v1307_v16  ;;  %vm1246_vm1 = vcmp.gt.f32.partialorder %v1156_v53, 0.0  ;;  %v1278_v55 = vmul.f32 0.01, %v1156_v53 }
 0x2a4   :  { %vm1245_vm2 = vcmp.gt.f32.partialorder %v1151_v54, 0.0  ;;  %v1277_v5 = vmul.f32 0.01, %v1151_v54  ;;  %v1607_v22 = vpop.f32.mrb[16].mxu1 }
 0x2a5   :  { %v1310_v25 = vsel %vm1246_vm1, %v1156_v53, %v1278_v55  ;;  %v1166_v4 = vadd.f32 %v1607_v22, %v2413_v18  ;;  %v1160_v35 = vpop.f32.mrb[17].mxu1 }
 0x2a6   :  { %1343 = vst [vmem:[#allocation3 + $0x88] sm:$0xff] %v1310_v25  ;;  %v1309_v58 = vsel %vm1245_vm2, %v1151_v54, %v1277_v5  ;;  %v1161_v33 = vadd.f32 %v2413_v18, %v1160_v35 }
 0x2a7   :  { %1342 = vst [vmem:[#allocation3 + $0x80] sm:$0xff] %v1309_v58  ;;  %vm1248_vm3 = vcmp.gt.f32.partialorder %v1166_v4, 0.0  ;;  %v1280_v59 = vmul.f32 0.01, %v1166_v4 }
 0x2a8   :  { %vm1247_vm4 = vcmp.gt.f32.partialorder %v1161_v33, 0.0  ;;  %v1279_v19 = vmul.f32 0.01, %v1161_v33  ;;  %v1610_v28 = vpop.f32.mrb[18].mxu1 }
 0x2a9   :  { %v1312_v61 = vsel %vm1248_vm3, %v1166_v4, %v1280_v59  ;;  %v1176_v57 = vadd.f32 %v1610_v28, %v2413_v18  ;;  %v1170_v62 = vpop.f32.mrb[19].mxu1 }
 0x2aa   :  { %1345 = vst [vmem:[#allocation3 + $0x98] sm:$0xff] %v1312_v61  ;;  %v1311_v49 = vsel %vm1247_vm4, %v1161_v33, %v1279_v19  ;;  %v1171_v63 = vadd.f32 %v2413_v18, %v1170_v62 }
 0x2ab   :  { %1344 = vst [vmem:[#allocation3 + $0x90] sm:$0xff] %v1311_v49  ;;  %vm1250_vm5 = vcmp.gt.f32.partialorder %v1176_v57, 0.0  ;;  %v1282_v34 = vmul.f32 0.01, %v1176_v57 }
 0x2ac   :  { %vm1249_vm6 = vcmp.gt.f32.partialorder %v1171_v63, 0.0  ;;  %v1281_v1 = vmul.f32 0.01, %v1171_v63  ;;  %v1613_v56 = vpop.f32.mrb[20].mxu1 }
 0x2ad   :  { %v1314_v2 = vsel %vm1250_vm5, %v1176_v57, %v1282_v34  ;;  %v1186_v3 = vadd.f32 %v1613_v56, %v2413_v18  ;;  %v1180_v7 = vpop.f32.mrb[21].mxu1 }
 0x2ae   :  { %1347 = vst [vmem:[#allocation3 + $0xa8] sm:$0xff] %v1314_v2  ;;  %v1313_v10 = vsel %vm1249_vm6, %v1171_v63, %v1281_v1  ;;  %v1181_v6 = vadd.f32 %v2413_v18, %v1180_v7 }
 0x2af   :  { %1346 = vst [vmem:[#allocation3 + $0xa0] sm:$0xff] %v1313_v10  ;;  %vm1252_vm7 = vcmp.gt.f32.partialorder %v1186_v3, 0.0  ;;  %v1284_v36 = vmul.f32 0.01, %v1186_v3 }
 0x2b0   :  { %vm1251_vm8 = vcmp.gt.f32.partialorder %v1181_v6, 0.0  ;;  %v1283_v38 = vmul.f32 0.01, %v1181_v6  ;;  %v1616_v29 = vpop.f32.mrb[22].mxu1 }
 0x2b1   :  { %v1316_v26 = vsel %vm1252_vm7, %v1186_v3, %v1284_v36  ;;  %v1196_v51 = vadd.f32 %v1616_v29, %v2413_v18  ;;  %v1190_v11 = vpop.f32.mrb[23].mxu1 }
 0x2b2   :  { %1349 = vst [vmem:[#allocation3 + $0xb8] sm:$0xff] %v1316_v26  ;;  %v1315_v46 = vsel %vm1251_vm8, %v1181_v6, %v1283_v38  ;;  %v1191_v12 = vadd.f32 %v2413_v18, %v1190_v11 }
 0x2b3   :  { %1348 = vst [vmem:[#allocation3 + $0xb0] sm:$0xff] %v1315_v46  ;;  %vm1254_vm9 = vcmp.gt.f32.partialorder %v1196_v51, 0.0  ;;  %v1286_v13 = vmul.f32 0.01, %v1196_v51 }
 0x2b4   :  { %vm1253_vm10 = vcmp.gt.f32.partialorder %v1191_v12, 0.0  ;;  %v1285_v39 = vmul.f32 0.01, %v1191_v12  ;;  %v1619_v14 = vpop.f32.mrb[24].mxu1 }
 0x2b5   :  { %v1318_v15 = vsel %vm1254_vm9, %v1196_v51, %v1286_v13  ;;  %v1206_v45 = vadd.f32 %v1619_v14, %v2413_v18  ;;  %v1200_v17 = vpop.f32.mrb[25].mxu1 }
 0x2b6   :  { %1351 = vst [vmem:[#allocation3 + $0xc8] sm:$0xff] %v1318_v15  ;;  %v1317_v30 = vsel %vm1253_vm10, %v1191_v12, %v1285_v39  ;;  %v1201_v42 = vadd.f32 %v2413_v18, %v1200_v17 }
 0x2b7   :  { %1350 = vst [vmem:[#allocation3 + $0xc0] sm:$0xff] %v1317_v30  ;;  %vm1256_vm11 = vcmp.gt.f32.partialorder %v1206_v45, 0.0  ;;  %v1288_v0 = vmul.f32 0.01, %v1206_v45 }
 0x2b8   :  { %vm1255_vm12 = vcmp.gt.f32.partialorder %v1201_v42, 0.0  ;;  %v1287_v20 = vmul.f32 0.01, %v1201_v42  ;;  %v1622_v41 = vpop.f32.mrb[26].mxu1 }
 0x2b9   :  { %v1320_v21 = vsel %vm1256_vm11, %v1206_v45, %v1288_v0  ;;  %v1216_v60 = vadd.f32 %v1622_v41, %v2413_v18  ;;  %v1210_v23 = vpop.f32.mrb[27].mxu1 }
 0x2ba   :  { %1353 = vst [vmem:[#allocation3 + $0xd8] sm:$0xff] %v1320_v21  ;;  %v1319_v24 = vsel %vm1255_vm12, %v1201_v42, %v1287_v20  ;;  %v1211_v27 = vadd.f32 %v2413_v18, %v1210_v23 }
 0x2bb   :  { %1352 = vst [vmem:[#allocation3 + $0xd0] sm:$0xff] %v1319_v24  ;;  %vm1258_vm13 = vcmp.gt.f32.partialorder %v1216_v60, 0.0  ;;  %v1290_v9 = vmul.f32 0.01, %v1216_v60 }
 0x2bc   :  { %vm1257_vm14 = vcmp.gt.f32.partialorder %v1211_v27, 0.0  ;;  %v1289_v40 = vmul.f32 0.01, %v1211_v27  ;;  %v1625_v47 = vpop.f32.mrb[28].mxu1 }
 0x2bd   :  { %v1322_v43 = vsel %vm1258_vm13, %v1216_v60, %v1290_v9  ;;  %v1226_v48 = vadd.f32 %v1625_v47, %v2413_v18  ;;  %v1220_v50 = vpop.f32.mrb[29].mxu1 }
 0x2be   :  { %1355 = vst [vmem:[#allocation3 + $0xe8] sm:$0xff] %v1322_v43  ;;  %v1321_v52 = vsel %vm1257_vm14, %v1211_v27, %v1289_v40  ;;  %v1221_v31 = vadd.f32 %v2413_v18, %v1220_v50 }
 0x2bf   :  { %1354 = vst [vmem:[#allocation3 + $0xe0] sm:$0xff] %v1321_v52  ;;  %vm1260_vm15 = vcmp.gt.f32.partialorder %v1226_v48, 0.0  ;;  %v1292_v37 = vmul.f32 0.01, %v1226_v48 }
 0x2c0   :  { %vm1259_vm0 = vcmp.gt.f32.partialorder %v1221_v31, 0.0  ;;  %v1291_v8 = vmul.f32 0.01, %v1221_v31 }
 0x2c1   :  { %v1324_v44 = vsel %vm1260_vm15, %v1226_v48, %v1292_v37 }
 0x2c2   :  { %1357 = vst [vmem:[#allocation3 + $0xf8] sm:$0xff] %v1324_v44  ;;  %v1323_v53 = vsel %vm1259_vm0, %v1221_v31, %v1291_v8 }
 0x2c3   :  { %1356 = vst [vmem:[#allocation3 + $0xf0] sm:$0xff] %v1323_v53 }
 0x2c4   :  { %1688 = shalt.err (!%p1685_p4)
}
 0x2c5   :  { %s1689_s6 = scalar_lea.hbm %s2470_s11, 4096 }
 0x2c6   :  { %p1690_p5 = scmp.ne.s32.totalorder %s2470_s11, %s1689_s6  ;;  %p1693_p6 = scmp.lt.u32.totalorder %s1689_s6, %s2470_s11 }
 0x2c8   :  { %p1695_p7 = pnand %p1693_p6, %p1690_p5 }
 0x2ca   :  { %1698 = shalt.err (!%p1695_p7)
}
 0x2cb   :  { %s1704_s30 = smov 128   ;;  %s1705_s2 = smov 8  }
 0x2cc   :  { %1369 = dma.vmem_to_hbm [thread:$0]  %s1364_s10, 4096, %s2470_s11, [#allocation4], %s1704_s30, %s1704_s30, %s1705_s2  }
 0x2cd   :  { %1699 = dma.done.wait [#allocation4], 4096  }
 0x2ce   :  { %1700 = vsyncadd [#allocation4], 4294963200 }
 0x2cf   :  { %1373 = vsyncpa [#allocation4], 1 }

</bundles_post_ra>
